<compile_context>
chip_gen: v7x
topology: tpu7x:2x2x1
jax: 0.10.0
libtpu: 0.0.40
codegen_flags: <defaults>
</compile_context>

<pallas_src>
import math

import jax
import jax.numpy as jnp
from jax.experimental import pallas as pl
from jax.experimental.pallas import tpu as pltpu


CONFIG = dict(nbins=12, pre_avg=2, post_avg=2, pre_max=2, post_max=2, threshold=0.1)
# NOTE: config['threshold'] is stored by the PyTorch module but never used in forward();
#       the reference pick_peak hard-codes the literal 0.1.


def _make_rhythm_kernel(nbins: int, win_mean: int, win_max: int, J_pad: int, T: int):
    """Build the Pallas kernel body (all shapes static at trace time)."""
    n = T - 2                      # envelope / output length (matches reference)
    nvx = n - win_max + 1          # valid support of the windowed stats
    assert nbins >= 1 and 1 <= win_mean <= win_max and 2 <= nvx <= n

    # 8-step transcendental-free binary search for floor(angle in degrees):
    # conditionally rotate the half-plane-folded gradient by -128,-64,...,-1 deg.
    # We accumulate (k % nbins) instead of k so the final mod acts on a small
    # exact integer.
    steps = [(float(k % nbins), math.cos(math.radians(k)), math.sin(math.radians(k)))
             for k in (128, 64, 32, 16, 8, 4, 2, 1)]
    inv_nbins = 1.0 / nbins

    def kernel(g_ref, peak_ref, env_ref):
        # g_ref: [B, 2*J_pad, T]  -- x-plane rows then y-plane rows, time on lanes.
        px = g_ref[:, 0:J_pad]                      # [B, J_pad, T]
        py = g_ref[:, J_pad:2 * J_pad]
        B = px.shape[0]

        # motion = pose[:, 1:] - pose[:, :-1]  (temporal gradient)
        gx = px[:, :, 1:] - px[:, :, :-1]           # [B, J_pad, T-1]
        gy = py[:, :, 1:] - py[:, :, :-1]
        mag = jnp.sqrt(gx * gx + gy * gy)

        # ---- directogram binning -----------------------------------------
        # torch: bin = floor((atan2(gy, gx) * 180/pi) % 180) % nbins
        # Fold the direction into the upper half plane (== angle mod 180 deg).
        flip = (gy < 0.0) | ((gy == 0.0) & (gx < 0.0))
        x = jnp.where(flip, -gx, gx)
        y = jnp.where(flip, -gy, gy)

        degm = jnp.zeros_like(x)
        for kmod, c, s in steps:
            xr = x * c + y * s                      # rotate by -k degrees
            yr = y * c - x * s
            take = yr >= 0.0                        # remaining angle >= k degrees
            x = jnp.where(take, xr, x)
            y = jnp.where(take, yr, y)
            if kmod != 0.0:
                degm = degm + kmod * take.astype(jnp.float32)
        # degm == floor(angle_deg) (mod nbins), an exact small integer in f32.
        # NOTE: zero gradients (gx=gy=0, incl. padded joints) accept every step
        # (bin 3 for nbins=12 instead of atan2's bin 0) -- harmless: mag == 0.
        # TODO(synk): exact 1-degree boundaries can tie-break one bin away from
        # torch's atan2 path (zero-measure, magnitude-weighted).
        pbin = degm - float(nbins) * jnp.floor((degm + 0.5) * inv_nbins)   # [B, J_pad, T-1]

        # ---- spectral flux / rhythm envelope ------------------------------
        # scatter_(set) + joint sum == per-bin masked sum over joints; accumulate
        # relu(directo[t+1, b] - directo[t, b]) directly into the envelope.
        env = jnp.zeros((B, n), jnp.float32)
        for b in range(nbins):
            db = jnp.sum(jnp.where(pbin == float(b), mag, 0.0), axis=1)    # [B, T-1]
            env = env + jnp.maximum(db[:, 1:] - db[:, :-1], 0.0)           # [B, n]

        # normalize by the per-sequence max; eps guard (torch would emit NaN on
        # an all-zero envelope).  approx reciprocal + 1 Newton step ~= exact f32.
        env_max = jnp.maximum(jnp.max(env, axis=1, keepdims=True), 1e-30)  # [B, 1]
        r = pl.reciprocal(env_max, approx=True)
        r = r * (2.0 - env_max * r)
        env = env * r

        # ---- pick_peak ----------------------------------------------------
        # "rhy_global_max" in the reference is actually the envelope mean.
        g_mean = jnp.sum(env, axis=1, keepdims=True) * (1.0 / n)           # [B, 1]

        # Windowed mean/max only on their valid support [0, nvx); the reference
        # right-zero-pads beyond it, which forces peak == 0 there
        # (0 - local_mean <= 0 <= 0.1 * g_mean), so that region is skipped.
        # NOTE: small lane-offset slices of single-lane-tile arrays -- cheap here.
        lmean = env[:, 0:nvx]
        for k in range(1, win_mean):
            lmean = lmean + env[:, k:k + nvx]
        lmean = lmean * (1.0 / win_mean)
        lmax = env[:, 0:nvx]
        for k in range(1, win_max):
            lmax = jnp.maximum(lmax, env[:, k:k + nvx])

        peak = ((lmax - lmean > 0.1 * g_mean)
                & (lmax == env[:, 0:nvx])).astype(jnp.int32)               # [B, nvx]

        # Keep only the last frame of each run of peaks (reference multiplies by
        # the padded forward-difference mask, which also zeroes the final frame).
        # peak is identically 0 for positions >= nvx, so only three disjoint
        # stores are needed -- no zero-init + overwrite.
        env_ref[...] = env                                                 # single full store
        peak_ref[:, pl.ds(0, nvx - 1)] = peak[:, 0:nvx - 1] * (1 - peak[:, 1:nvx])
        peak_ref[:, pl.ds(nvx - 1, 1)] = peak[:, nvx - 1:nvx]
        if nvx < n:
            peak_ref[:, pl.ds(nvx, n - nvx)] = jnp.zeros((B, n - nvx), jnp.int32)

    return kernel


def rhythm_encoder_forward(pose, config=CONFIG):
    """pose: [bs, T, J, 3] -> (rhy_peak [bs, T-2] int32, rhy_env [bs, T-2, 1] f32)."""
    nbins = config['nbins']
    win_mean = config['post_avg'] + config['pre_avg']
    win_max = config['post_max'] + config['pre_max']
    bs, T, J, _ = pose.shape
    n = T - 2

    # Batch tiling: whole batch in one grid step when small; 8-batch tiles
    # (sublane-aligned blocks) with "parallel" semantics otherwise.
    if bs <= 8:
        b_tile, num_tiles = bs, 1
    else:
        b_tile = 8
        num_tiles = int(pl.cdiv(bs, b_tile))
    bs_pad = b_tile * num_tiles
    J_pad = ((J + 7) // 8) * 8     # sublane-align joints -> whole-row joint reduces

    # Layout plumbing (one XLA transpose): single fused input, time on lanes,
    # x rows stacked over y rows on sublanes; z coordinate is unused by forward().
    g = jnp.transpose(pose[..., :2].astype(jnp.float32), (0, 3, 2, 1))     # [bs, 2, J, T]
    g = jnp.pad(g, ((0, bs_pad - bs), (0, 0), (0, J_pad - J), (0, 0)))
    g = g.reshape(bs_pad, 2 * J_pad, T)

    kernel = _make_rhythm_kernel(nbins, win_mean, win_max, J_pad, T)

    peak, env = pl.pallas_call(
        kernel,
        out_shape=(jax.ShapeDtypeStruct((bs_pad, n), jnp.int32),
                   jax.ShapeDtypeStruct((bs_pad, n), jnp.float32)),
        grid=(num_tiles,),
        in_specs=[pl.BlockSpec((b_tile, 2 * J_pad, T), lambda i: (i, 0, 0))],
        out_specs=(pl.BlockSpec((b_tile, n), lambda i: (i, 0)),
                   pl.BlockSpec((b_tile, n), lambda i: (i, 0))),
        compiler_params=pltpu.CompilerParams(
            dimension_semantics=("parallel",)),
    )(g)

    # TODO(synk): torch returns int64 (.long()) peaks; emitted as int32 here (JAX x64 off).
    return peak[:bs], env[:bs, :, None]          # (rhy_peak, rhy_env.unsqueeze(-1))


if __name__ == "__main__":
    key = jax.random.PRNGKey(0)
    # bs=2, context_length=16, 17 joints, 3 coords (as implied by the docstring)
    pose = jax.random.normal(key, (2, 16, 17, 3), dtype=jnp.float32)

    rhy_peak, rhy_env = rhythm_encoder_forward(pose)
    jax.block_until_ready((rhy_peak, rhy_env))

    assert rhy_peak.shape == (2, 14) and rhy_peak.dtype == jnp.int32
    assert rhy_env.shape == (2, 14, 1) and rhy_env.dtype == jnp.float32
    assert bool(jnp.isfinite(rhy_env).all())
    print("KERNEL_OK")
</pallas_src>

<mosaic_0001>
module attributes {stable_mosaic.version = 11 : i64} {
  func.func @kernel(%arg0: i32, %arg1: memref<2x48x16xf32, #tpu.memory_space<vmem>>, %arg2: memref<2x14xi32, #tpu.memory_space<vmem>>, %arg3: memref<2x14xf32, #tpu.memory_space<vmem>>) attributes {dimension_semantics = [#tpu.dimension_semantics<parallel>], iteration_bounds = array<i64: 1>, scalar_prefetch = 0 : i64, scratch_operands = 0 : i64, tpu.core_type = #tpu.core_type<tc>, window_params = [{transform_indices = @transform_0, window_bounds = array<i64: 2, 48, 16>}, {transform_indices = @transform_1, window_bounds = array<i64: 2, 14>}, {transform_indices = @transform_2, window_bounds = array<i64: 2, 14>}]} {
    %c0 = arith.constant 0 : index
    %c0_0 = arith.constant 0 : index
    %c0_1 = arith.constant 0 : index
    %0 = vector.load %arg1[%c0, %c0_0, %c0_1] : memref<2x48x16xf32, #tpu.memory_space<vmem>>, vector<2x24x16xf32>
    %c0_2 = arith.constant 0 : index
    %c24 = arith.constant 24 : index
    %c0_3 = arith.constant 0 : index
    %1 = vector.load %arg1[%c0_2, %c24, %c0_3] : memref<2x48x16xf32, #tpu.memory_space<vmem>>, vector<2x24x16xf32>
    %2 = vector.extract_strided_slice %0 {offsets = [0, 0, 1], sizes = [2, 24, 15], strides = [1, 1, 1]} : vector<2x24x16xf32> to vector<2x24x15xf32>
    %3 = vector.extract_strided_slice %0 {offsets = [0, 0, 0], sizes = [2, 24, 15], strides = [1, 1, 1]} : vector<2x24x16xf32> to vector<2x24x15xf32>
    %4 = arith.subf %2, %3 : vector<2x24x15xf32>
    %5 = vector.extract_strided_slice %1 {offsets = [0, 0, 1], sizes = [2, 24, 15], strides = [1, 1, 1]} : vector<2x24x16xf32> to vector<2x24x15xf32>
    %6 = vector.extract_strided_slice %1 {offsets = [0, 0, 0], sizes = [2, 24, 15], strides = [1, 1, 1]} : vector<2x24x16xf32> to vector<2x24x15xf32>
    %7 = arith.subf %5, %6 : vector<2x24x15xf32>
    %8 = arith.mulf %4, %4 : vector<2x24x15xf32>
    %9 = arith.mulf %7, %7 : vector<2x24x15xf32>
    %10 = arith.addf %8, %9 : vector<2x24x15xf32>
    %11 = math.sqrt %10 : vector<2x24x15xf32>
    %cst = arith.constant 0.000000e+00 : f32
    %12 = vector.broadcast %cst : f32 to vector<2x24x15xf32>
    %13 = arith.cmpf olt, %7, %12 : vector<2x24x15xf32>
    %cst_4 = arith.constant 0.000000e+00 : f32
    %14 = vector.broadcast %cst_4 : f32 to vector<2x24x15xf32>
    %15 = arith.cmpf oeq, %7, %14 : vector<2x24x15xf32>
    %cst_5 = arith.constant 0.000000e+00 : f32
    %16 = vector.broadcast %cst_5 : f32 to vector<2x24x15xf32>
    %17 = arith.cmpf olt, %4, %16 : vector<2x24x15xf32>
    %18 = arith.andi %15, %17 : vector<2x24x15xi1>
    %19 = arith.ori %13, %18 : vector<2x24x15xi1>
    %cst_6 = arith.constant 0.000000e+00 : f32
    %20 = vector.broadcast %cst_6 : f32 to vector<2x24x15xf32>
    %21 = arith.subf %20, %4 : vector<2x24x15xf32>
    %22 = arith.select %19, %21, %4 : vector<2x24x15xi1>, vector<2x24x15xf32>
    %cst_7 = arith.constant 0.000000e+00 : f32
    %23 = vector.broadcast %cst_7 : f32 to vector<2x24x15xf32>
    %24 = arith.subf %23, %7 : vector<2x24x15xf32>
    %25 = arith.select %19, %24, %7 : vector<2x24x15xi1>, vector<2x24x15xf32>
    %cst_8 = arith.constant 0.000000e+00 : f32
    %26 = vector.broadcast %cst_8 : f32 to vector<2x24x15xf32>
    %cst_9 = arith.constant -0.615661502 : f32
    %27 = vector.broadcast %cst_9 : f32 to vector<2x24x15xf32>
    %28 = arith.mulf %22, %27 : vector<2x24x15xf32>
    %cst_10 = arith.constant 0.788010776 : f32
    %29 = vector.broadcast %cst_10 : f32 to vector<2x24x15xf32>
    %30 = arith.mulf %25, %29 : vector<2x24x15xf32>
    %31 = arith.addf %28, %30 : vector<2x24x15xf32>
    %cst_11 = arith.constant -0.615661502 : f32
    %32 = vector.broadcast %cst_11 : f32 to vector<2x24x15xf32>
    %33 = arith.mulf %25, %32 : vector<2x24x15xf32>
    %cst_12 = arith.constant 0.788010776 : f32
    %34 = vector.broadcast %cst_12 : f32 to vector<2x24x15xf32>
    %35 = arith.mulf %22, %34 : vector<2x24x15xf32>
    %36 = arith.subf %33, %35 : vector<2x24x15xf32>
    %cst_13 = arith.constant 0.000000e+00 : f32
    %37 = vector.broadcast %cst_13 : f32 to vector<2x24x15xf32>
    %38 = arith.cmpf oge, %36, %37 : vector<2x24x15xf32>
    %39 = arith.select %38, %31, %22 : vector<2x24x15xi1>, vector<2x24x15xf32>
    %40 = arith.select %38, %36, %25 : vector<2x24x15xi1>, vector<2x24x15xf32>
    %41 = arith.extui %38 : vector<2x24x15xi1> to vector<2x24x15xi32>
    %42 = arith.sitofp %41 : vector<2x24x15xi32> to vector<2x24x15xf32>
    %cst_14 = arith.constant 8.000000e+00 : f32
    %43 = vector.broadcast %cst_14 : f32 to vector<2x24x15xf32>
    %44 = arith.mulf %43, %42 : vector<2x24x15xf32>
    %45 = arith.addf %26, %44 : vector<2x24x15xf32>
    %cst_15 = arith.constant 0.438371152 : f32
    %46 = vector.broadcast %cst_15 : f32 to vector<2x24x15xf32>
    %47 = arith.mulf %39, %46 : vector<2x24x15xf32>
    %cst_16 = arith.constant 0.898794054 : f32
    %48 = vector.broadcast %cst_16 : f32 to vector<2x24x15xf32>
    %49 = arith.mulf %40, %48 : vector<2x24x15xf32>
    %50 = arith.addf %47, %49 : vector<2x24x15xf32>
    %cst_17 = arith.constant 0.438371152 : f32
    %51 = vector.broadcast %cst_17 : f32 to vector<2x24x15xf32>
    %52 = arith.mulf %40, %51 : vector<2x24x15xf32>
    %cst_18 = arith.constant 0.898794054 : f32
    %53 = vector.broadcast %cst_18 : f32 to vector<2x24x15xf32>
    %54 = arith.mulf %39, %53 : vector<2x24x15xf32>
    %55 = arith.subf %52, %54 : vector<2x24x15xf32>
    %cst_19 = arith.constant 0.000000e+00 : f32
    %56 = vector.broadcast %cst_19 : f32 to vector<2x24x15xf32>
    %57 = arith.cmpf oge, %55, %56 : vector<2x24x15xf32>
    %58 = arith.select %57, %50, %39 : vector<2x24x15xi1>, vector<2x24x15xf32>
    %59 = arith.select %57, %55, %40 : vector<2x24x15xi1>, vector<2x24x15xf32>
    %60 = arith.extui %57 : vector<2x24x15xi1> to vector<2x24x15xi32>
    %61 = arith.sitofp %60 : vector<2x24x15xi32> to vector<2x24x15xf32>
    %cst_20 = arith.constant 4.000000e+00 : f32
    %62 = vector.broadcast %cst_20 : f32 to vector<2x24x15xf32>
    %63 = arith.mulf %62, %61 : vector<2x24x15xf32>
    %64 = arith.addf %45, %63 : vector<2x24x15xf32>
    %cst_21 = arith.constant 0.84804809 : f32
    %65 = vector.broadcast %cst_21 : f32 to vector<2x24x15xf32>
    %66 = arith.mulf %58, %65 : vector<2x24x15xf32>
    %cst_22 = arith.constant 0.529919267 : f32
    %67 = vector.broadcast %cst_22 : f32 to vector<2x24x15xf32>
    %68 = arith.mulf %59, %67 : vector<2x24x15xf32>
    %69 = arith.addf %66, %68 : vector<2x24x15xf32>
    %cst_23 = arith.constant 0.84804809 : f32
    %70 = vector.broadcast %cst_23 : f32 to vector<2x24x15xf32>
    %71 = arith.mulf %59, %70 : vector<2x24x15xf32>
    %cst_24 = arith.constant 0.529919267 : f32
    %72 = vector.broadcast %cst_24 : f32 to vector<2x24x15xf32>
    %73 = arith.mulf %58, %72 : vector<2x24x15xf32>
    %74 = arith.subf %71, %73 : vector<2x24x15xf32>
    %cst_25 = arith.constant 0.000000e+00 : f32
    %75 = vector.broadcast %cst_25 : f32 to vector<2x24x15xf32>
    %76 = arith.cmpf oge, %74, %75 : vector<2x24x15xf32>
    %77 = arith.select %76, %69, %58 : vector<2x24x15xi1>, vector<2x24x15xf32>
    %78 = arith.select %76, %74, %59 : vector<2x24x15xi1>, vector<2x24x15xf32>
    %79 = arith.extui %76 : vector<2x24x15xi1> to vector<2x24x15xi32>
    %80 = arith.sitofp %79 : vector<2x24x15xi32> to vector<2x24x15xf32>
    %cst_26 = arith.constant 8.000000e+00 : f32
    %81 = vector.broadcast %cst_26 : f32 to vector<2x24x15xf32>
    %82 = arith.mulf %81, %80 : vector<2x24x15xf32>
    %83 = arith.addf %64, %82 : vector<2x24x15xf32>
    %cst_27 = arith.constant 0.961261689 : f32
    %84 = vector.broadcast %cst_27 : f32 to vector<2x24x15xf32>
    %85 = arith.mulf %77, %84 : vector<2x24x15xf32>
    %cst_28 = arith.constant 0.275637358 : f32
    %86 = vector.broadcast %cst_28 : f32 to vector<2x24x15xf32>
    %87 = arith.mulf %78, %86 : vector<2x24x15xf32>
    %88 = arith.addf %85, %87 : vector<2x24x15xf32>
    %cst_29 = arith.constant 0.961261689 : f32
    %89 = vector.broadcast %cst_29 : f32 to vector<2x24x15xf32>
    %90 = arith.mulf %78, %89 : vector<2x24x15xf32>
    %cst_30 = arith.constant 0.275637358 : f32
    %91 = vector.broadcast %cst_30 : f32 to vector<2x24x15xf32>
    %92 = arith.mulf %77, %91 : vector<2x24x15xf32>
    %93 = arith.subf %90, %92 : vector<2x24x15xf32>
    %cst_31 = arith.constant 0.000000e+00 : f32
    %94 = vector.broadcast %cst_31 : f32 to vector<2x24x15xf32>
    %95 = arith.cmpf oge, %93, %94 : vector<2x24x15xf32>
    %96 = arith.select %95, %88, %77 : vector<2x24x15xi1>, vector<2x24x15xf32>
    %97 = arith.select %95, %93, %78 : vector<2x24x15xi1>, vector<2x24x15xf32>
    %98 = arith.extui %95 : vector<2x24x15xi1> to vector<2x24x15xi32>
    %99 = arith.sitofp %98 : vector<2x24x15xi32> to vector<2x24x15xf32>
    %cst_32 = arith.constant 4.000000e+00 : f32
    %100 = vector.broadcast %cst_32 : f32 to vector<2x24x15xf32>
    %101 = arith.mulf %100, %99 : vector<2x24x15xf32>
    %102 = arith.addf %83, %101 : vector<2x24x15xf32>
    %cst_33 = arith.constant 0.990268051 : f32
    %103 = vector.broadcast %cst_33 : f32 to vector<2x24x15xf32>
    %104 = arith.mulf %96, %103 : vector<2x24x15xf32>
    %cst_34 = arith.constant 0.139173105 : f32
    %105 = vector.broadcast %cst_34 : f32 to vector<2x24x15xf32>
    %106 = arith.mulf %97, %105 : vector<2x24x15xf32>
    %107 = arith.addf %104, %106 : vector<2x24x15xf32>
    %cst_35 = arith.constant 0.990268051 : f32
    %108 = vector.broadcast %cst_35 : f32 to vector<2x24x15xf32>
    %109 = arith.mulf %97, %108 : vector<2x24x15xf32>
    %cst_36 = arith.constant 0.139173105 : f32
    %110 = vector.broadcast %cst_36 : f32 to vector<2x24x15xf32>
    %111 = arith.mulf %96, %110 : vector<2x24x15xf32>
    %112 = arith.subf %109, %111 : vector<2x24x15xf32>
    %cst_37 = arith.constant 0.000000e+00 : f32
    %113 = vector.broadcast %cst_37 : f32 to vector<2x24x15xf32>
    %114 = arith.cmpf oge, %112, %113 : vector<2x24x15xf32>
    %115 = arith.select %114, %107, %96 : vector<2x24x15xi1>, vector<2x24x15xf32>
    %116 = arith.select %114, %112, %97 : vector<2x24x15xi1>, vector<2x24x15xf32>
    %117 = arith.extui %114 : vector<2x24x15xi1> to vector<2x24x15xi32>
    %118 = arith.sitofp %117 : vector<2x24x15xi32> to vector<2x24x15xf32>
    %cst_38 = arith.constant 8.000000e+00 : f32
    %119 = vector.broadcast %cst_38 : f32 to vector<2x24x15xf32>
    %120 = arith.mulf %119, %118 : vector<2x24x15xf32>
    %121 = arith.addf %102, %120 : vector<2x24x15xf32>
    %cst_39 = arith.constant 0.997564077 : f32
    %122 = vector.broadcast %cst_39 : f32 to vector<2x24x15xf32>
    %123 = arith.mulf %115, %122 : vector<2x24x15xf32>
    %cst_40 = arith.constant 0.0697564706 : f32
    %124 = vector.broadcast %cst_40 : f32 to vector<2x24x15xf32>
    %125 = arith.mulf %116, %124 : vector<2x24x15xf32>
    %126 = arith.addf %123, %125 : vector<2x24x15xf32>
    %cst_41 = arith.constant 0.997564077 : f32
    %127 = vector.broadcast %cst_41 : f32 to vector<2x24x15xf32>
    %128 = arith.mulf %116, %127 : vector<2x24x15xf32>
    %cst_42 = arith.constant 0.0697564706 : f32
    %129 = vector.broadcast %cst_42 : f32 to vector<2x24x15xf32>
    %130 = arith.mulf %115, %129 : vector<2x24x15xf32>
    %131 = arith.subf %128, %130 : vector<2x24x15xf32>
    %cst_43 = arith.constant 0.000000e+00 : f32
    %132 = vector.broadcast %cst_43 : f32 to vector<2x24x15xf32>
    %133 = arith.cmpf oge, %131, %132 : vector<2x24x15xf32>
    %134 = arith.select %133, %126, %115 : vector<2x24x15xi1>, vector<2x24x15xf32>
    %135 = arith.select %133, %131, %116 : vector<2x24x15xi1>, vector<2x24x15xf32>
    %136 = arith.extui %133 : vector<2x24x15xi1> to vector<2x24x15xi32>
    %137 = arith.sitofp %136 : vector<2x24x15xi32> to vector<2x24x15xf32>
    %cst_44 = arith.constant 4.000000e+00 : f32
    %138 = vector.broadcast %cst_44 : f32 to vector<2x24x15xf32>
    %139 = arith.mulf %138, %137 : vector<2x24x15xf32>
    %140 = arith.addf %121, %139 : vector<2x24x15xf32>
    %cst_45 = arith.constant 0.99939084 : f32
    %141 = vector.broadcast %cst_45 : f32 to vector<2x24x15xf32>
    %142 = arith.mulf %134, %141 : vector<2x24x15xf32>
    %cst_46 = arith.constant 0.0348994955 : f32
    %143 = vector.broadcast %cst_46 : f32 to vector<2x24x15xf32>
    %144 = arith.mulf %135, %143 : vector<2x24x15xf32>
    %145 = arith.addf %142, %144 : vector<2x24x15xf32>
    %cst_47 = arith.constant 0.99939084 : f32
    %146 = vector.broadcast %cst_47 : f32 to vector<2x24x15xf32>
    %147 = arith.mulf %135, %146 : vector<2x24x15xf32>
    %cst_48 = arith.constant 0.0348994955 : f32
    %148 = vector.broadcast %cst_48 : f32 to vector<2x24x15xf32>
    %149 = arith.mulf %134, %148 : vector<2x24x15xf32>
    %150 = arith.subf %147, %149 : vector<2x24x15xf32>
    %cst_49 = arith.constant 0.000000e+00 : f32
    %151 = vector.broadcast %cst_49 : f32 to vector<2x24x15xf32>
    %152 = arith.cmpf oge, %150, %151 : vector<2x24x15xf32>
    %153 = arith.select %152, %145, %134 : vector<2x24x15xi1>, vector<2x24x15xf32>
    %154 = arith.select %152, %150, %135 : vector<2x24x15xi1>, vector<2x24x15xf32>
    %155 = arith.extui %152 : vector<2x24x15xi1> to vector<2x24x15xi32>
    %156 = arith.sitofp %155 : vector<2x24x15xi32> to vector<2x24x15xf32>
    %cst_50 = arith.constant 2.000000e+00 : f32
    %157 = vector.broadcast %cst_50 : f32 to vector<2x24x15xf32>
    %158 = arith.mulf %157, %156 : vector<2x24x15xf32>
    %159 = arith.addf %140, %158 : vector<2x24x15xf32>
    %cst_51 = arith.constant 0.99984771 : f32
    %160 = vector.broadcast %cst_51 : f32 to vector<2x24x15xf32>
    %161 = arith.mulf %154, %160 : vector<2x24x15xf32>
    %cst_52 = arith.constant 0.0174524058 : f32
    %162 = vector.broadcast %cst_52 : f32 to vector<2x24x15xf32>
    %163 = arith.mulf %153, %162 : vector<2x24x15xf32>
    %164 = arith.subf %161, %163 : vector<2x24x15xf32>
    %cst_53 = arith.constant 0.000000e+00 : f32
    %165 = vector.broadcast %cst_53 : f32 to vector<2x24x15xf32>
    %166 = arith.cmpf oge, %164, %165 : vector<2x24x15xf32>
    %167 = arith.extui %166 : vector<2x24x15xi1> to vector<2x24x15xi32>
    %168 = arith.sitofp %167 : vector<2x24x15xi32> to vector<2x24x15xf32>
    %cst_54 = arith.constant 1.000000e+00 : f32
    %169 = vector.broadcast %cst_54 : f32 to vector<2x24x15xf32>
    %170 = arith.mulf %169, %168 : vector<2x24x15xf32>
    %171 = arith.addf %159, %170 : vector<2x24x15xf32>
    %cst_55 = arith.constant 5.000000e-01 : f32
    %172 = vector.broadcast %cst_55 : f32 to vector<2x24x15xf32>
    %173 = arith.addf %171, %172 : vector<2x24x15xf32>
    %cst_56 = arith.constant 0.0833333358 : f32
    %174 = vector.broadcast %cst_56 : f32 to vector<2x24x15xf32>
    %175 = arith.mulf %173, %174 : vector<2x24x15xf32>
    %176 = math.floor %175 : vector<2x24x15xf32>
    %cst_57 = arith.constant 1.200000e+01 : f32
    %177 = vector.broadcast %cst_57 : f32 to vector<2x24x15xf32>
    %178 = arith.mulf %177, %176 : vector<2x24x15xf32>
    %179 = arith.subf %171, %178 : vector<2x24x15xf32>
    %cst_58 = arith.constant 0.000000e+00 : f32
    %180 = vector.broadcast %cst_58 : f32 to vector<2x14xf32>
    %cst_59 = arith.constant 0.000000e+00 : f32
    %181 = vector.broadcast %cst_59 : f32 to vector<2x24x15xf32>
    %182 = arith.cmpf oeq, %179, %181 : vector<2x24x15xf32>
    %cst_60 = arith.constant 0.000000e+00 : f32
    %183 = vector.broadcast %cst_60 : f32 to vector<2x24x15xf32>
    %184 = arith.select %182, %11, %183 : vector<2x24x15xi1>, vector<2x24x15xf32>
    %cst_61 = arith.constant dense<0.000000e+00> : vector<2x15xf32>
    %185 = vector.multi_reduction <add>, %184, %cst_61 [1] : vector<2x24x15xf32> to vector<2x15xf32>
    %186 = vector.extract_strided_slice %185 {offsets = [0, 1], sizes = [2, 14], strides = [1, 1]} : vector<2x15xf32> to vector<2x14xf32>
    %187 = vector.extract_strided_slice %185 {offsets = [0, 0], sizes = [2, 14], strides = [1, 1]} : vector<2x15xf32> to vector<2x14xf32>
    %188 = arith.subf %186, %187 : vector<2x14xf32>
    %cst_62 = arith.constant 0.000000e+00 : f32
    %189 = vector.broadcast %cst_62 : f32 to vector<2x14xf32>
    %190 = arith.maximumf %188, %189 : vector<2x14xf32>
    %191 = arith.addf %180, %190 : vector<2x14xf32>
    %cst_63 = arith.constant 1.000000e+00 : f32
    %192 = vector.broadcast %cst_63 : f32 to vector<2x24x15xf32>
    %193 = arith.cmpf oeq, %179, %192 : vector<2x24x15xf32>
    %cst_64 = arith.constant 0.000000e+00 : f32
    %194 = vector.broadcast %cst_64 : f32 to vector<2x24x15xf32>
    %195 = arith.select %193, %11, %194 : vector<2x24x15xi1>, vector<2x24x15xf32>
    %cst_65 = arith.constant dense<0.000000e+00> : vector<2x15xf32>
    %196 = vector.multi_reduction <add>, %195, %cst_65 [1] : vector<2x24x15xf32> to vector<2x15xf32>
    %197 = vector.extract_strided_slice %196 {offsets = [0, 1], sizes = [2, 14], strides = [1, 1]} : vector<2x15xf32> to vector<2x14xf32>
    %198 = vector.extract_strided_slice %196 {offsets = [0, 0], sizes = [2, 14], strides = [1, 1]} : vector<2x15xf32> to vector<2x14xf32>
    %199 = arith.subf %197, %198 : vector<2x14xf32>
    %cst_66 = arith.constant 0.000000e+00 : f32
    %200 = vector.broadcast %cst_66 : f32 to vector<2x14xf32>
    %201 = arith.maximumf %199, %200 : vector<2x14xf32>
    %202 = arith.addf %191, %201 : vector<2x14xf32>
    %cst_67 = arith.constant 2.000000e+00 : f32
    %203 = vector.broadcast %cst_67 : f32 to vector<2x24x15xf32>
    %204 = arith.cmpf oeq, %179, %203 : vector<2x24x15xf32>
    %cst_68 = arith.constant 0.000000e+00 : f32
    %205 = vector.broadcast %cst_68 : f32 to vector<2x24x15xf32>
    %206 = arith.select %204, %11, %205 : vector<2x24x15xi1>, vector<2x24x15xf32>
    %cst_69 = arith.constant dense<0.000000e+00> : vector<2x15xf32>
    %207 = vector.multi_reduction <add>, %206, %cst_69 [1] : vector<2x24x15xf32> to vector<2x15xf32>
    %208 = vector.extract_strided_slice %207 {offsets = [0, 1], sizes = [2, 14], strides = [1, 1]} : vector<2x15xf32> to vector<2x14xf32>
    %209 = vector.extract_strided_slice %207 {offsets = [0, 0], sizes = [2, 14], strides = [1, 1]} : vector<2x15xf32> to vector<2x14xf32>
    %210 = arith.subf %208, %209 : vector<2x14xf32>
    %cst_70 = arith.constant 0.000000e+00 : f32
    %211 = vector.broadcast %cst_70 : f32 to vector<2x14xf32>
    %212 = arith.maximumf %210, %211 : vector<2x14xf32>
    %213 = arith.addf %202, %212 : vector<2x14xf32>
    %cst_71 = arith.constant 3.000000e+00 : f32
    %214 = vector.broadcast %cst_71 : f32 to vector<2x24x15xf32>
    %215 = arith.cmpf oeq, %179, %214 : vector<2x24x15xf32>
    %cst_72 = arith.constant 0.000000e+00 : f32
    %216 = vector.broadcast %cst_72 : f32 to vector<2x24x15xf32>
    %217 = arith.select %215, %11, %216 : vector<2x24x15xi1>, vector<2x24x15xf32>
    %cst_73 = arith.constant dense<0.000000e+00> : vector<2x15xf32>
    %218 = vector.multi_reduction <add>, %217, %cst_73 [1] : vector<2x24x15xf32> to vector<2x15xf32>
    %219 = vector.extract_strided_slice %218 {offsets = [0, 1], sizes = [2, 14], strides = [1, 1]} : vector<2x15xf32> to vector<2x14xf32>
    %220 = vector.extract_strided_slice %218 {offsets = [0, 0], sizes = [2, 14], strides = [1, 1]} : vector<2x15xf32> to vector<2x14xf32>
    %221 = arith.subf %219, %220 : vector<2x14xf32>
    %cst_74 = arith.constant 0.000000e+00 : f32
    %222 = vector.broadcast %cst_74 : f32 to vector<2x14xf32>
    %223 = arith.maximumf %221, %222 : vector<2x14xf32>
    %224 = arith.addf %213, %223 : vector<2x14xf32>
    %cst_75 = arith.constant 4.000000e+00 : f32
    %225 = vector.broadcast %cst_75 : f32 to vector<2x24x15xf32>
    %226 = arith.cmpf oeq, %179, %225 : vector<2x24x15xf32>
    %cst_76 = arith.constant 0.000000e+00 : f32
    %227 = vector.broadcast %cst_76 : f32 to vector<2x24x15xf32>
    %228 = arith.select %226, %11, %227 : vector<2x24x15xi1>, vector<2x24x15xf32>
    %cst_77 = arith.constant dense<0.000000e+00> : vector<2x15xf32>
    %229 = vector.multi_reduction <add>, %228, %cst_77 [1] : vector<2x24x15xf32> to vector<2x15xf32>
    %230 = vector.extract_strided_slice %229 {offsets = [0, 1], sizes = [2, 14], strides = [1, 1]} : vector<2x15xf32> to vector<2x14xf32>
    %231 = vector.extract_strided_slice %229 {offsets = [0, 0], sizes = [2, 14], strides = [1, 1]} : vector<2x15xf32> to vector<2x14xf32>
    %232 = arith.subf %230, %231 : vector<2x14xf32>
    %cst_78 = arith.constant 0.000000e+00 : f32
    %233 = vector.broadcast %cst_78 : f32 to vector<2x14xf32>
    %234 = arith.maximumf %232, %233 : vector<2x14xf32>
    %235 = arith.addf %224, %234 : vector<2x14xf32>
    %cst_79 = arith.constant 5.000000e+00 : f32
    %236 = vector.broadcast %cst_79 : f32 to vector<2x24x15xf32>
    %237 = arith.cmpf oeq, %179, %236 : vector<2x24x15xf32>
    %cst_80 = arith.constant 0.000000e+00 : f32
    %238 = vector.broadcast %cst_80 : f32 to vector<2x24x15xf32>
    %239 = arith.select %237, %11, %238 : vector<2x24x15xi1>, vector<2x24x15xf32>
    %cst_81 = arith.constant dense<0.000000e+00> : vector<2x15xf32>
    %240 = vector.multi_reduction <add>, %239, %cst_81 [1] : vector<2x24x15xf32> to vector<2x15xf32>
    %241 = vector.extract_strided_slice %240 {offsets = [0, 1], sizes = [2, 14], strides = [1, 1]} : vector<2x15xf32> to vector<2x14xf32>
    %242 = vector.extract_strided_slice %240 {offsets = [0, 0], sizes = [2, 14], strides = [1, 1]} : vector<2x15xf32> to vector<2x14xf32>
    %243 = arith.subf %241, %242 : vector<2x14xf32>
    %cst_82 = arith.constant 0.000000e+00 : f32
    %244 = vector.broadcast %cst_82 : f32 to vector<2x14xf32>
    %245 = arith.maximumf %243, %244 : vector<2x14xf32>
    %246 = arith.addf %235, %245 : vector<2x14xf32>
    %cst_83 = arith.constant 6.000000e+00 : f32
    %247 = vector.broadcast %cst_83 : f32 to vector<2x24x15xf32>
    %248 = arith.cmpf oeq, %179, %247 : vector<2x24x15xf32>
    %cst_84 = arith.constant 0.000000e+00 : f32
    %249 = vector.broadcast %cst_84 : f32 to vector<2x24x15xf32>
    %250 = arith.select %248, %11, %249 : vector<2x24x15xi1>, vector<2x24x15xf32>
    %cst_85 = arith.constant dense<0.000000e+00> : vector<2x15xf32>
    %251 = vector.multi_reduction <add>, %250, %cst_85 [1] : vector<2x24x15xf32> to vector<2x15xf32>
    %252 = vector.extract_strided_slice %251 {offsets = [0, 1], sizes = [2, 14], strides = [1, 1]} : vector<2x15xf32> to vector<2x14xf32>
    %253 = vector.extract_strided_slice %251 {offsets = [0, 0], sizes = [2, 14], strides = [1, 1]} : vector<2x15xf32> to vector<2x14xf32>
    %254 = arith.subf %252, %253 : vector<2x14xf32>
    %cst_86 = arith.constant 0.000000e+00 : f32
    %255 = vector.broadcast %cst_86 : f32 to vector<2x14xf32>
    %256 = arith.maximumf %254, %255 : vector<2x14xf32>
    %257 = arith.addf %246, %256 : vector<2x14xf32>
    %cst_87 = arith.constant 7.000000e+00 : f32
    %258 = vector.broadcast %cst_87 : f32 to vector<2x24x15xf32>
    %259 = arith.cmpf oeq, %179, %258 : vector<2x24x15xf32>
    %cst_88 = arith.constant 0.000000e+00 : f32
    %260 = vector.broadcast %cst_88 : f32 to vector<2x24x15xf32>
    %261 = arith.select %259, %11, %260 : vector<2x24x15xi1>, vector<2x24x15xf32>
    %cst_89 = arith.constant dense<0.000000e+00> : vector<2x15xf32>
    %262 = vector.multi_reduction <add>, %261, %cst_89 [1] : vector<2x24x15xf32> to vector<2x15xf32>
    %263 = vector.extract_strided_slice %262 {offsets = [0, 1], sizes = [2, 14], strides = [1, 1]} : vector<2x15xf32> to vector<2x14xf32>
    %264 = vector.extract_strided_slice %262 {offsets = [0, 0], sizes = [2, 14], strides = [1, 1]} : vector<2x15xf32> to vector<2x14xf32>
    %265 = arith.subf %263, %264 : vector<2x14xf32>
    %cst_90 = arith.constant 0.000000e+00 : f32
    %266 = vector.broadcast %cst_90 : f32 to vector<2x14xf32>
    %267 = arith.maximumf %265, %266 : vector<2x14xf32>
    %268 = arith.addf %257, %267 : vector<2x14xf32>
    %cst_91 = arith.constant 8.000000e+00 : f32
    %269 = vector.broadcast %cst_91 : f32 to vector<2x24x15xf32>
    %270 = arith.cmpf oeq, %179, %269 : vector<2x24x15xf32>
    %cst_92 = arith.constant 0.000000e+00 : f32
    %271 = vector.broadcast %cst_92 : f32 to vector<2x24x15xf32>
    %272 = arith.select %270, %11, %271 : vector<2x24x15xi1>, vector<2x24x15xf32>
    %cst_93 = arith.constant dense<0.000000e+00> : vector<2x15xf32>
    %273 = vector.multi_reduction <add>, %272, %cst_93 [1] : vector<2x24x15xf32> to vector<2x15xf32>
    %274 = vector.extract_strided_slice %273 {offsets = [0, 1], sizes = [2, 14], strides = [1, 1]} : vector<2x15xf32> to vector<2x14xf32>
    %275 = vector.extract_strided_slice %273 {offsets = [0, 0], sizes = [2, 14], strides = [1, 1]} : vector<2x15xf32> to vector<2x14xf32>
    %276 = arith.subf %274, %275 : vector<2x14xf32>
    %cst_94 = arith.constant 0.000000e+00 : f32
    %277 = vector.broadcast %cst_94 : f32 to vector<2x14xf32>
    %278 = arith.maximumf %276, %277 : vector<2x14xf32>
    %279 = arith.addf %268, %278 : vector<2x14xf32>
    %cst_95 = arith.constant 9.000000e+00 : f32
    %280 = vector.broadcast %cst_95 : f32 to vector<2x24x15xf32>
    %281 = arith.cmpf oeq, %179, %280 : vector<2x24x15xf32>
    %cst_96 = arith.constant 0.000000e+00 : f32
    %282 = vector.broadcast %cst_96 : f32 to vector<2x24x15xf32>
    %283 = arith.select %281, %11, %282 : vector<2x24x15xi1>, vector<2x24x15xf32>
    %cst_97 = arith.constant dense<0.000000e+00> : vector<2x15xf32>
    %284 = vector.multi_reduction <add>, %283, %cst_97 [1] : vector<2x24x15xf32> to vector<2x15xf32>
    %285 = vector.extract_strided_slice %284 {offsets = [0, 1], sizes = [2, 14], strides = [1, 1]} : vector<2x15xf32> to vector<2x14xf32>
    %286 = vector.extract_strided_slice %284 {offsets = [0, 0], sizes = [2, 14], strides = [1, 1]} : vector<2x15xf32> to vector<2x14xf32>
    %287 = arith.subf %285, %286 : vector<2x14xf32>
    %cst_98 = arith.constant 0.000000e+00 : f32
    %288 = vector.broadcast %cst_98 : f32 to vector<2x14xf32>
    %289 = arith.maximumf %287, %288 : vector<2x14xf32>
    %290 = arith.addf %279, %289 : vector<2x14xf32>
    %cst_99 = arith.constant 1.000000e+01 : f32
    %291 = vector.broadcast %cst_99 : f32 to vector<2x24x15xf32>
    %292 = arith.cmpf oeq, %179, %291 : vector<2x24x15xf32>
    %cst_100 = arith.constant 0.000000e+00 : f32
    %293 = vector.broadcast %cst_100 : f32 to vector<2x24x15xf32>
    %294 = arith.select %292, %11, %293 : vector<2x24x15xi1>, vector<2x24x15xf32>
    %cst_101 = arith.constant dense<0.000000e+00> : vector<2x15xf32>
    %295 = vector.multi_reduction <add>, %294, %cst_101 [1] : vector<2x24x15xf32> to vector<2x15xf32>
    %296 = vector.extract_strided_slice %295 {offsets = [0, 1], sizes = [2, 14], strides = [1, 1]} : vector<2x15xf32> to vector<2x14xf32>
    %297 = vector.extract_strided_slice %295 {offsets = [0, 0], sizes = [2, 14], strides = [1, 1]} : vector<2x15xf32> to vector<2x14xf32>
    %298 = arith.subf %296, %297 : vector<2x14xf32>
    %cst_102 = arith.constant 0.000000e+00 : f32
    %299 = vector.broadcast %cst_102 : f32 to vector<2x14xf32>
    %300 = arith.maximumf %298, %299 : vector<2x14xf32>
    %301 = arith.addf %290, %300 : vector<2x14xf32>
    %cst_103 = arith.constant 1.100000e+01 : f32
    %302 = vector.broadcast %cst_103 : f32 to vector<2x24x15xf32>
    %303 = arith.cmpf oeq, %179, %302 : vector<2x24x15xf32>
    %cst_104 = arith.constant 0.000000e+00 : f32
    %304 = vector.broadcast %cst_104 : f32 to vector<2x24x15xf32>
    %305 = arith.select %303, %11, %304 : vector<2x24x15xi1>, vector<2x24x15xf32>
    %cst_105 = arith.constant dense<0.000000e+00> : vector<2x15xf32>
    %306 = vector.multi_reduction <add>, %305, %cst_105 [1] : vector<2x24x15xf32> to vector<2x15xf32>
    %307 = vector.extract_strided_slice %306 {offsets = [0, 1], sizes = [2, 14], strides = [1, 1]} : vector<2x15xf32> to vector<2x14xf32>
    %308 = vector.extract_strided_slice %306 {offsets = [0, 0], sizes = [2, 14], strides = [1, 1]} : vector<2x15xf32> to vector<2x14xf32>
    %309 = arith.subf %307, %308 : vector<2x14xf32>
    %cst_106 = arith.constant 0.000000e+00 : f32
    %310 = vector.broadcast %cst_106 : f32 to vector<2x14xf32>
    %311 = arith.maximumf %309, %310 : vector<2x14xf32>
    %312 = arith.addf %301, %311 : vector<2x14xf32>
    %cst_107 = arith.constant dense<0xFF800000> : vector<2xf32>
    %313 = vector.multi_reduction <maximumf>, %312, %cst_107 [1] : vector<2x14xf32> to vector<2xf32>
    %314 = vector.shape_cast %313 : vector<2xf32> to vector<2x1xf32>
    %cst_108 = arith.constant 1.000000e-30 : f32
    %315 = vector.broadcast %cst_108 : f32 to vector<2x1xf32>
    %316 = arith.maximumf %314, %315 : vector<2x1xf32>
    %317 = tpu.reciprocal %316 {approx = true} : vector<2x1xf32> -> vector<2x1xf32>
    %318 = arith.mulf %316, %317 : vector<2x1xf32>
    %cst_109 = arith.constant 2.000000e+00 : f32
    %319 = vector.broadcast %cst_109 : f32 to vector<2x1xf32>
    %320 = arith.subf %319, %318 : vector<2x1xf32>
    %321 = arith.mulf %317, %320 : vector<2x1xf32>
    %322 = vector.broadcast %321 : vector<2x1xf32> to vector<2x14xf32>
    %323 = arith.mulf %312, %322 : vector<2x14xf32>
    %cst_110 = arith.constant dense<0.000000e+00> : vector<2xf32>
    %324 = vector.multi_reduction <add>, %323, %cst_110 [1] : vector<2x14xf32> to vector<2xf32>
    %325 = vector.shape_cast %324 : vector<2xf32> to vector<2x1xf32>
    %cst_111 = arith.constant 0.0714285746 : f32
    %326 = vector.broadcast %cst_111 : f32 to vector<2x1xf32>
    %327 = arith.mulf %325, %326 : vector<2x1xf32>
    %328 = vector.extract_strided_slice %323 {offsets = [0, 0], sizes = [2, 11], strides = [1, 1]} : vector<2x14xf32> to vector<2x11xf32>
    %329 = vector.extract_strided_slice %323 {offsets = [0, 1], sizes = [2, 11], strides = [1, 1]} : vector<2x14xf32> to vector<2x11xf32>
    %330 = arith.addf %328, %329 : vector<2x11xf32>
    %331 = vector.extract_strided_slice %323 {offsets = [0, 2], sizes = [2, 11], strides = [1, 1]} : vector<2x14xf32> to vector<2x11xf32>
    %332 = arith.addf %330, %331 : vector<2x11xf32>
    %333 = vector.extract_strided_slice %323 {offsets = [0, 3], sizes = [2, 11], strides = [1, 1]} : vector<2x14xf32> to vector<2x11xf32>
    %334 = arith.addf %332, %333 : vector<2x11xf32>
    %cst_112 = arith.constant 2.500000e-01 : f32
    %335 = vector.broadcast %cst_112 : f32 to vector<2x11xf32>
    %336 = arith.mulf %334, %335 : vector<2x11xf32>
    %337 = vector.extract_strided_slice %323 {offsets = [0, 0], sizes = [2, 11], strides = [1, 1]} : vector<2x14xf32> to vector<2x11xf32>
    %338 = vector.extract_strided_slice %323 {offsets = [0, 1], sizes = [2, 11], strides = [1, 1]} : vector<2x14xf32> to vector<2x11xf32>
    %339 = arith.maximumf %337, %338 : vector<2x11xf32>
    %340 = vector.extract_strided_slice %323 {offsets = [0, 2], sizes = [2, 11], strides = [1, 1]} : vector<2x14xf32> to vector<2x11xf32>
    %341 = arith.maximumf %339, %340 : vector<2x11xf32>
    %342 = vector.extract_strided_slice %323 {offsets = [0, 3], sizes = [2, 11], strides = [1, 1]} : vector<2x14xf32> to vector<2x11xf32>
    %343 = arith.maximumf %341, %342 : vector<2x11xf32>
    %344 = arith.subf %343, %336 : vector<2x11xf32>
    %cst_113 = arith.constant 1.000000e-01 : f32
    %345 = vector.broadcast %cst_113 : f32 to vector<2x1xf32>
    %346 = arith.mulf %345, %327 : vector<2x1xf32>
    %347 = vector.broadcast %346 : vector<2x1xf32> to vector<2x11xf32>
    %348 = arith.cmpf ogt, %344, %347 : vector<2x11xf32>
    %349 = vector.extract_strided_slice %323 {offsets = [0, 0], sizes = [2, 11], strides = [1, 1]} : vector<2x14xf32> to vector<2x11xf32>
    %350 = arith.cmpf oeq, %343, %349 : vector<2x11xf32>
    %351 = arith.andi %348, %350 : vector<2x11xi1>
    %352 = arith.extui %351 : vector<2x11xi1> to vector<2x11xi32>
    %c0_114 = arith.constant 0 : index
    %c0_115 = arith.constant 0 : index
    %353 = vector.load %arg3[%c0_114, %c0_115] : memref<2x14xf32, #tpu.memory_space<vmem>>, vector<2x14xf32>
    tpu.vector_store %arg3[%c0_114, %c0_115], %323 {strides = array<i32>} : memref<2x14xf32, #tpu.memory_space<vmem>>, vector<2x14xf32>,
    %354 = vector.extract_strided_slice %352 {offsets = [0, 0], sizes = [2, 10], strides = [1, 1]} : vector<2x11xi32> to vector<2x10xi32>
    %355 = vector.extract_strided_slice %352 {offsets = [0, 1], sizes = [2, 10], strides = [1, 1]} : vector<2x11xi32> to vector<2x10xi32>
    %c1_i32 = arith.constant 1 : i32
    %356 = vector.broadcast %c1_i32 : i32 to vector<2x10xi32>
    %357 = arith.subi %356, %355 : vector<2x10xi32>
    %358 = arith.muli %354, %357 : vector<2x10xi32>
    %c0_116 = arith.constant 0 : index
    %c0_117 = arith.constant 0 : index
    %359 = vector.load %arg2[%c0_116, %c0_117] : memref<2x14xi32, #tpu.memory_space<vmem>>, vector<2x10xi32>
    tpu.vector_store %arg2[%c0_116, %c0_117], %358 {strides = array<i32>} : memref<2x14xi32, #tpu.memory_space<vmem>>, vector<2x10xi32>,
    %360 = vector.extract_strided_slice %352 {offsets = [0, 10], sizes = [2, 1], strides = [1, 1]} : vector<2x11xi32> to vector<2x1xi32>
    %c0_118 = arith.constant 0 : index
    %c10 = arith.constant 10 : index
    %361 = vector.load %arg2[%c0_118, %c10] : memref<2x14xi32, #tpu.memory_space<vmem>>, vector<2x1xi32>
    tpu.vector_store %arg2[%c0_118, %c10], %360 {strides = array<i32>} : memref<2x14xi32, #tpu.memory_space<vmem>>, vector<2x1xi32>,
    %c0_i32 = arith.constant 0 : i32
    %362 = vector.broadcast %c0_i32 : i32 to vector<2x3xi32>
    %c0_119 = arith.constant 0 : index
    %c11 = arith.constant 11 : index
    %363 = vector.load %arg2[%c0_119, %c11] : memref<2x14xi32, #tpu.memory_space<vmem>>, vector<2x3xi32>
    tpu.vector_store %arg2[%c0_119, %c11], %362 {strides = array<i32>} : memref<2x14xi32, #tpu.memory_space<vmem>>, vector<2x3xi32>,
    return
  }
  func.func @transform_0(%arg0: i32) -> (i32, i32, i32) {
    %c0_i32 = arith.constant 0 : i32
    %c0_i32_0 = arith.constant 0 : i32
    %c0_i32_1 = arith.constant 0 : i32
    return %arg0, %c0_i32, %c0_i32_0 : i32, i32, i32
  }
  func.func @transform_1(%arg0: i32) -> (i32, i32) {
    %c0_i32 = arith.constant 0 : i32
    %c0_i32_0 = arith.constant 0 : i32
    return %arg0, %c0_i32 : i32, i32
  }
  func.func @transform_2(%arg0: i32) -> (i32, i32) {
    %c0_i32 = arith.constant 0 : i32
    %c0_i32_0 = arith.constant 0 : i32
    return %arg0, %c0_i32 : i32, i32
  }
}

</mosaic_0001>

<bundles_post_ra>
// kernel: tpu_custom_call.1
= control target key start
LH: loop header
LB: loop body
LE: loop exit
PB: predicated region body
PF: predicated region fallthrough
CT: control target
= control target key end

     0   :  { %8 = vsyncpa [#allocation3], 0  ;;  %s1642_s13 = smov 1   ;;  %s2506_s0 = inlined_call_operand.vmem [shape: f32[2,48,16], index: 0, kind: input, shape index: {}]   ;;  %s2507_s1 = inlined_call_operand.hbm [shape: s32[2,14], index: 1, kind: output, shape index: {0}]   ;;  %s2508_s2 = inlined_call_operand.hbm [shape: f32[2,14], index: 2, kind: output, shape index: {1}]  }
   0x1   :  { %v21_v0 = vld [vmem:[%s2506_s0 + $0x48] sm:$0xff]  ;;  %v15_v1 = vld [vmem:[%s2506_s0 + $0x30] sm:$0xff]  ;;  %v16_v3 = vld [vmem:[%s2506_s0 + $0x38] sm:$0xff] }
   0x2   :  { %66 = vrot.lane.b32.xlu1 %v21_v0, %s1642_s13  ;;  %36 = vrot.lane.b32.xlu0 %v15_v1, %s1642_s13  ;;  %v22_v2 = vld [vmem:[%s2506_s0 + $0x50] sm:$0xff] }
   0x3   :  { %9 = vsyncpa [#allocation5], 0  ;;  %v1684_v4 = vld [vmem:[%s2506_s0 + $0x8] sm:$0xff]  ;;  %v1689_v5 = vld [vmem:[%s2506_s0] sm:$0xff]  ;;  %v1643_v54 = vmov 0.0   ;;  %s1645_s6 = smov 126  }
   0x4   :  { %v1698_v6 = vld [vmem:[%s2506_s0 + $0x18] sm:$0xff]  ;;  %v1703_v7 = vld [vmem:[%s2506_s0 + $0x40] sm:$0xff]  ;;  %v1726_v10 = vld [vmem:[%s2506_s0 + $0x28] sm:$0xff]  ;;  %s1646_s7 = smov 125   ;;  %s1648_s8 = smov [#allocation4]  }
   0x5   :  { %v1712_v8 = vld [vmem:[%s2506_s0 + $0x58] sm:$0xff]  ;;  %v1717_v9 = vld [vmem:[%s2506_s0 + $0x20] sm:$0xff]  ;;  %v1731_v11 = vld [vmem:[%s2506_s0 + $0x10] sm:$0xff]  ;;  %s1644_s0 = smov 127   ;;  %s1512_s9 = sshll.u32 %s1648_s8, 4  ;;  %s1513_s9 = int_to_ptr.vmem [resolvable:$true] %s1512_s9 }
   0x6   :  { %68 = vrot.lane.b32.xlu1 %v22_v2, %s1642_s13  ;;  %38 = vrot.lane.b32.xlu0 %v16_v3, %s1642_s13  ;;  %s1594_s10 = scalar_lea.vmem %s1513_s9, 32  ;;  %p1599_p1 = scmp.lt.s32.totalorder %s1513_s9, %s1513_s9 }
   0x7   :  { %p1595_p0 = scmp.ne.s32.totalorder %s1513_s9, %s1594_s10  ;;  %p1600_p2 = scmp.lt.s32.totalorder %s1594_s10, %s1594_s10 }
   0x9   :  { %p1601_p3 = por %p1600_p2, %p1599_p1 }
   0xa   :  { %32 = vrot.lane.b32.xlu1 %v1684_v4, %s1642_s13  ;;  %30 = vrot.lane.b32.xlu0 %v1689_v5, %s1642_s13 }
   0xb   :  { %p1602_p4 = pnand %p1601_p3, %p1595_p0 }
   0xe   :  { %60 = vrot.lane.b32.xlu1 %v1698_v6, %s1642_s13  ;;  %40 = vrot.lane.b32.xlu0 %v1703_v7, %s1642_s13 }
  0x12   :  { %70 = vrot.lane.b32.xlu1 %v1712_v8, %s1642_s13  ;;  %62 = vrot.lane.b32.xlu0 %v1717_v9, %s1642_s13 }
  0x16   :  { %64 = vrot.lane.b32.xlu1 %v1726_v10, %s1642_s13  ;;  %34 = vrot.lane.b32.xlu0 %v1731_v11, %s1642_s13 }
  0x74   :  { %v67_v12 = vpop.permute.xlu1 %66  ;;  %v37_v13 = vpop.permute.xlu0 %36 }
  0x75   :  { %v81_v14 = vsub.f32 %v21_v0, %v67_v12  ;;  %v51_v15 = vsub.f32 %v15_v1, %v37_v13 }
  0x77   :  { %v189_v16 = vsub.f32 0.0, %v81_v14  ;;  %v93_v17 = vmul.f32 %v81_v14, %v81_v14  ;;  %vm147_vm0 = vcmp.lt.f32.partialorder %v81_v14, 0.0  ;;  %vm153_vm1 = vcmp.eq.f32.partialorder %v81_v14, 0.0 }
  0x78   :  { %v87_v18 = vmul.f32 %v51_v15, %v51_v15  ;;  %vm159_vm2 = vcmp.lt.f32.partialorder %v51_v15, 0.0  ;;  %v177_v19 = vsub.f32 0.0, %v51_v15  ;;  %v69_v20 = vpop.permute.xlu1 %68  ;;  %v39_v21 = vpop.permute.xlu0 %38 }
  0x79   :  { %vm165_vm3 = vmand %vm153_vm1, %vm159_vm2  ;;  %v82_v22 = vsub.f32 %v22_v2, %v69_v20  ;;  %v52_v23 = vsub.f32 %v16_v3, %v39_v21 }
  0x7a   :  { %vm171_vm4 = vmor %vm147_vm0, %vm165_vm3  ;;  %v1737_v24 = vadd.f32 %v93_v17, %v87_v18 }
  0x7b   :  { %v183_v25 = vsel %vm171_vm4, %v177_v19, %v51_v15  ;;  %v195_v26 = vsel %vm171_vm4, %v189_v16, %v81_v14  ;;  %v190_v27 = vsub.f32 0.0, %v82_v22  ;;  %vm148_vm5 = vcmp.lt.f32.partialorder %v82_v22, 0.0 }
  0x7c   :  { %v201_v28 = vmul.f32 -0.6156615, %v183_v25  ;;  %v207_v29 = vmul.f32 0.7880108, %v195_v26  ;;  %v219_v30 = vmul.f32 -0.6156615, %v195_v26  ;;  %1580 = vrsqrt.f32 %v1737_v24  ;;  %v33_v37 = vpop.permute.xlu1 %32  ;;  %v31_v46 = vpop.permute.xlu0 %30 }
  0x7d   :  { %v225_v31 = vmul.f32 0.7880108, %v183_v25  ;;  %vm154_vm6 = vcmp.eq.f32.partialorder %v82_v22, 0.0  ;;  %vm160_vm7 = vcmp.lt.f32.partialorder %v52_v23, 0.0  ;;  %v178_v33 = vsub.f32 0.0, %v52_v23 }
  0x7e   :  { %v213_v32 = vadd.f32 %v207_v29, %v201_v28  ;;  %vm166_vm8 = vmand %vm154_vm6, %vm160_vm7  ;;  %v94_v35 = vmul.f32 %v82_v22, %v82_v22  ;;  %v88_v36 = vmul.f32 %v52_v23, %v52_v23  ;;  %v1745_v53 = vsub.f32 %v1684_v4, %v33_v37 }
  0x7f   :  { %v231_v34 = vsub.f32 %v219_v30, %v225_v31  ;;  %vm172_vm9 = vmor %vm148_vm5, %vm166_vm8  ;;  %vm125_vm11 = vcmp.eq.f32.partialorder %v1737_v24, inf  ;;  %v128_v61 = vand.u32 2147483648, %v1737_v24  ;;  %v1754_v63 = vsub.f32 %v1689_v5, %v31_v46 }
  0x80   :  { %v184_v38 = vsel %vm172_vm9, %v178_v33, %v52_v23  ;;  %v196_v39 = vsel %vm172_vm9, %v190_v27, %v82_v22  ;;  %v1742_v44 = vadd.f32 %v94_v35, %v88_v36  ;;  %v61_v57 = vpop.permute.xlu1 %60  ;;  %vm127_vm13 = vcmp.eq.f32.partialorder %v1737_v24, 0.0  ;;  %v41_v4 = vpop.permute.xlu0 %40 }
  0x81   :  { %vm237_vm10 = vcmp.ge.f32.partialorder %v231_v34, 0.0  ;;  %v202_v45 = vmul.f32 -0.6156615, %v184_v38  ;;  %v208_v49 = vmul.f32 0.7880108, %v196_v39  ;;  %v1761_v3 = vmul.f32 %v1745_v53, %v1745_v53 }
  0x82   :  { %v243_v40 = vsel %vm237_vm10, %v213_v32, %v183_v25  ;;  %v249_v41 = vsel %vm237_vm10, %v231_v34, %v195_v26  ;;  %v220_v51 = vmul.f32 -0.6156615, %v196_v39  ;;  %v226_v52 = vmul.f32 0.7880108, %v184_v38 }
  0x83   :  { %v279_v42 = vmul.f32 0.43837115, %v243_v40  ;;  %v285_v43 = vmul.f32 0.89879405, %v249_v41  ;;  %v297_v47 = vmul.f32 0.43837115, %v249_v41  ;;  %1582 = vrsqrt.f32 %v1742_v44 }
  0x84   :  { %v303_v48 = vmul.f32 0.89879405, %v243_v40  ;;  %v1527_v55 = vsel %vm237_vm10, 1.0, %v1643_v54  ;;  %v214_v58 = vadd.f32 %v208_v49, %v202_v45  ;;  %v232_v59 = vsub.f32 %v220_v51, %v226_v52  ;;  %v71_v21 = vpop.permute.xlu1 %70  ;;  %v63_v33 = vpop.permute.xlu0 %62 }
  0x85   :  { %v291_v50 = vadd.f32 %v285_v43, %v279_v42  ;;  %v135_v62 = vand.u32 2147483648, %v1742_v44  ;;  %v267_v0 = vmul.f32 8.0, %v1527_v55  ;;  %v175_v14 = vsub.f32 0.0, %v1745_v53 }
  0x86   :  { %v309_v56 = vsub.f32 %v297_v47, %v303_v48  ;;  %v1581_v60 = vpop.eup %1580  ;;  %vm238_vm14 = vcmp.ge.f32.partialorder %v232_v59, 0.0  ;;  %vm156_vm15 = vcmp.lt.f32.partialorder %v1754_v63, 0.0  ;;  %v1769_v20 = vsub.f32 %v1698_v6, %v61_v57 }
  0x87   :  { %v124_v5 = vmul.f32 %v1581_v60, %v1737_v24  ;;  %v244_v17 = vsel %vm238_vm14, %v214_v58, %v184_v38  ;;  %v250_v19 = vsel %vm238_vm14, %v232_v59, %v196_v39  ;;  %v174_v26 = vsub.f32 0.0, %v1754_v63 }
  0x88   :  { %vm315_vm12 = vcmp.ge.f32.partialorder %v309_v56, 0.0  ;;  %v280_v25 = vmul.f32 0.43837115, %v244_v17  ;;  %v286_v27 = vmul.f32 0.89879405, %v250_v19  ;;  %v84_v30 = vmul.f32 %v1754_v63, %v1754_v63 }
  0x89   :  { %v321_v1 = vsel %vm315_vm12, %v291_v50, %v243_v40  ;;  %v327_v2 = vsel %vm315_vm12, %v309_v56, %v249_v41  ;;  %v1533_v22 = vsel %vm315_vm12, 1.0, %v1643_v54  ;;  %v298_v28 = vmul.f32 0.43837115, %v250_v19 }
  0x8a   :  { %v357_v12 = vmul.f32 0.8480481, %v321_v1  ;;  %v363_v13 = vmul.f32 0.52991927, %v327_v2  ;;  %v375_v15 = vmul.f32 0.8480481, %v327_v2  ;;  %v126_v31 = vsel %vm125_vm11, %v1737_v24, %v124_v5 }
  0x8b   :  { %v381_v16 = vmul.f32 0.52991927, %v321_v1  ;;  %v304_v29 = vmul.f32 0.89879405, %v244_v17  ;;  %v1780_v6 = vsub.f32 %v1703_v7, %v41_v4  ;;  %v1783_v32 = vsub.f32 %v1712_v8, %v71_v21 }
  0x8c   :  { %v369_v18 = vadd.f32 %v363_v13, %v357_v12  ;;  %v292_v36 = vadd.f32 %v286_v27, %v280_v25  ;;  %vm150_vm1 = vcmp.eq.f32.partialorder %v1769_v20, 0.0  ;;  %v345_v38 = vmul.f32 4.0, %v1533_v22 }
  0x8d   :  { %v387_v23 = vsub.f32 %v375_v15, %v381_v16  ;;  %v1583_v37 = vpop.eup %1582  ;;  %v310_v41 = vsub.f32 %v298_v28, %v304_v29  ;;  %v1790_v7 = vsel %vm127_vm13, %v128_v61, %v126_v31  ;;  %v1793_v43 = vsub.f32 %v1717_v9, %v63_v33  ;;  %vm162_vm4 = vmand %vm150_vm1, %vm156_vm15 }
  0x8e   :  { %v90_v46 = vmul.f32 %v1769_v20, %v1769_v20  ;;  %vm144_vm3 = vcmp.lt.f32.partialorder %v1769_v20, 0.0  ;;  %v131_v24 = vmul.f32 %v1583_v37, %v1742_v44  ;;  %v351_v50 = vadd.f32 %v345_v38, %v267_v0 }
  0x8f   :  { %vm393_vm0 = vcmp.ge.f32.partialorder %v387_v23, 0.0  ;;  %vm316_vm2 = vcmp.ge.f32.partialorder %v310_v41, 0.0  ;;  %v1528_v9 = vsel %vm238_vm14, 1.0, %v1643_v54  ;;  %vm132_vm6 = vcmp.eq.f32.partialorder %v1742_v44, inf  ;;  %vm1810_vm7 = vmor %vm144_vm3, %vm162_vm4 }
  0x90   :  { %v399_v34 = vsel %vm393_vm0, %v369_v18, %v321_v1  ;;  %v405_v35 = vsel %vm393_vm0, %v387_v23, %v327_v2  ;;  %v322_v48 = vsel %vm316_vm2, %v292_v36, %v244_v17  ;;  %v328_v49 = vsel %vm316_vm2, %v310_v41, %v250_v19 }
  0x91   :  { %v435_v39 = vmul.f32 0.9612617, %v399_v34  ;;  %v441_v40 = vmul.f32 0.27563736, %v405_v35  ;;  %v453_v42 = vmul.f32 0.9612617, %v405_v35  ;;  %v1816_v61 = vadd.f32 %v90_v46, %v84_v30 }
  0x92   :  { %v459_v8 = vmul.f32 0.27563736, %v399_v34  ;;  %v358_v51 = vmul.f32 0.8480481, %v322_v48  ;;  %v364_v52 = vmul.f32 0.52991927, %v328_v49  ;;  %v1824_v16 = vsel %vm1810_vm7, %v174_v26, %v1754_v63 }
  0x93   :  { %v447_v45 = vadd.f32 %v441_v40, %v435_v39  ;;  %v1539_v55 = vsel %vm393_vm0, 1.0, %v1643_v54  ;;  %v376_v56 = vmul.f32 0.8480481, %v328_v49  ;;  %v382_v57 = vmul.f32 0.52991927, %v322_v48 }
  0x94   :  { %v465_v47 = vsub.f32 %v453_v42, %v459_v8  ;;  %v186_v0 = vsub.f32 0.0, %v1769_v20  ;;  %v1534_v4 = vsel %vm316_vm2, 1.0, %v1643_v54  ;;  %v370_v12 = vadd.f32 %v364_v52, %v358_v51 }
  0x95   :  { %v388_v15 = vsub.f32 %v376_v56, %v382_v57  ;;  %v423_v17 = vmul.f32 8.0, %v1539_v55  ;;  %vm134_vm8 = vcmp.eq.f32.partialorder %v1742_v44, 0.0  ;;  %v268_v21 = vmul.f32 8.0, %v1528_v9 }
  0x96   :  { %vm471_vm5 = vcmp.ge.f32.partialorder %v465_v47, 0.0  ;;  %v346_v23 = vmul.f32 4.0, %v1534_v4  ;;  %1584 = vrsqrt.f32 %v1816_v61  ;;  %v1833_v63 = vsel %vm1810_vm7, %v186_v0, %v1769_v20 }
  0x97   :  { %v477_v60 = vsel %vm471_vm5, %v447_v45, %v399_v34  ;;  %v483_v59 = vsel %vm471_vm5, %v465_v47, %v405_v35  ;;  %v1545_v18 = vsel %vm471_vm5, 1.0, %v1643_v54  ;;  %vm394_vm9 = vcmp.ge.f32.partialorder %v388_v15, 0.0 }
  0x98   :  { %v513_v1 = vmul.f32 0.99026805, %v477_v60  ;;  %v519_v2 = vmul.f32 0.1391731, %v483_v59  ;;  %v531_v13 = vmul.f32 0.99026805, %v483_v59  ;;  %v400_v25 = vsel %vm394_vm9, %v370_v12, %v322_v48 }
  0x99   :  { %v537_v5 = vmul.f32 0.1391731, %v477_v60  ;;  %v406_v27 = vsel %vm394_vm9, %v388_v15, %v328_v49  ;;  %v198_v26 = vmul.f32 -0.6156615, %v1824_v16  ;;  %v501_v28 = vmul.f32 4.0, %v1545_v18 }
  0x9a   :  { %v525_v19 = vadd.f32 %v519_v2, %v513_v1  ;;  %v436_v29 = vmul.f32 0.9612617, %v400_v25  ;;  %v442_v30 = vmul.f32 0.27563736, %v406_v27  ;;  %v1540_v34 = vsel %vm394_vm9, 1.0, %v1643_v54 }
  0x9b   :  { %v543_v22 = vsub.f32 %v531_v13, %v537_v5  ;;  %v454_v35 = vmul.f32 0.9612617, %v406_v27  ;;  %v133_v38 = vsel %vm132_vm6, %v1742_v44, %v131_v24  ;;  %v216_v20 = vmul.f32 -0.6156615, %v1833_v63 }
  0x9c   :  { %v429_v39 = vadd.f32 %v423_v17, %v351_v50  ;;  %v460_v42 = vmul.f32 0.27563736, %v400_v25  ;;  %v424_v46 = vmul.f32 8.0, %v1540_v34  ;;  %v448_v47 = vadd.f32 %v442_v30, %v436_v29 }
  0x9d   :  { %vm549_vm10 = vcmp.ge.f32.partialorder %v543_v22, 0.0  ;;  %v204_v9 = vmul.f32 0.7880108, %v1833_v63  ;;  %v222_v51 = vmul.f32 0.7880108, %v1824_v16  ;;  %v1848_v24 = vsel %vm134_vm8, %v135_v62, %v133_v38 }
  0x9e   :  { %v555_v31 = vsel %vm549_vm10, %v525_v19, %v477_v60  ;;  %v561_v33 = vsel %vm549_vm10, %v543_v22, %v483_v59  ;;  %v1551_v8 = vsel %vm549_vm10, 1.0, %v1643_v54  ;;  %v466_v49 = vsub.f32 %v454_v35, %v460_v42 }
  0x9f   :  { %v591_v36 = vmul.f32 0.9975641, %v555_v31  ;;  %v597_v37 = vmul.f32 0.06975647, %v561_v33  ;;  %v609_v40 = vmul.f32 0.9975641, %v561_v33  ;;  %v507_v52 = vadd.f32 %v501_v28, %v429_v39 }
  0xa0   :  { %v615_v41 = vmul.f32 0.06975647, %v555_v31  ;;  %v352_v50 = vadd.f32 %v346_v23, %v268_v21  ;;  %v107_v55 = vand.u32 2147483648, %v1816_v61  ;;  %v579_v56 = vmul.f32 8.0, %v1551_v8  ;;  %v1585_v58 = vpop.eup %1584 }
  0xa1   :  { %v603_v45 = vadd.f32 %v597_v37, %v591_v36  ;;  %vm472_vm12 = vcmp.ge.f32.partialorder %v466_v49, 0.0  ;;  %v1851_v57 = vsub.f32 %v216_v20, %v222_v51  ;;  %v210_v62 = vadd.f32 %v204_v9, %v198_v26 }
  0xa2   :  { %v621_v48 = vsub.f32 %v609_v40, %v615_v41  ;;  %v1853_v0 = vadd.f32 %v424_v46, %v352_v50  ;;  %v478_v1 = vsel %vm472_vm12, %v448_v47, %v400_v25  ;;  %v484_v44 = vsel %vm472_vm12, %v466_v49, %v406_v27 }
  0xa3   :  { %vm104_vm13 = vcmp.eq.f32.partialorder %v1816_v61, inf  ;;  %vm234_vm14 = vcmp.ge.f32.partialorder %v1851_v57, 0.0  ;;  %v585_v15 = vadd.f32 %v579_v56, %v507_v52  ;;  %v514_v18 = vmul.f32 0.99026805, %v478_v1 }
  0xa4   :  { %vm627_vm11 = vcmp.ge.f32.partialorder %v621_v48, 0.0  ;;  %v103_v19 = vmul.f32 %v1585_v58, %v1816_v61  ;;  %v520_v22 = vmul.f32 0.1391731, %v484_v44  ;;  %v532_v23 = vmul.f32 0.99026805, %v484_v44 }
  0xa5   :  { %v633_v60 = vsel %vm627_vm11, %v603_v45, %v555_v31  ;;  %v639_v59 = vsel %vm627_vm11, %v621_v48, %v561_v33  ;;  %v1557_v12 = vsel %vm627_vm11, 1.0, %v1643_v54  ;;  %v538_v25 = vmul.f32 0.1391731, %v478_v1 }
  0xa6   :  { %v669_v2 = vmul.f32 0.99939084, %v633_v60  ;;  %v675_v4 = vmul.f32 0.034899496, %v639_v59  ;;  %v687_v13 = vmul.f32 0.99939084, %v639_v59  ;;  %v240_v27 = vsel %vm234_vm14, %v210_v62, %v1824_v16 }
  0xa7   :  { %v693_v5 = vmul.f32 0.034899496, %v633_v60  ;;  %v657_v28 = vmul.f32 4.0, %v1557_v12  ;;  %v89_v26 = vmul.f32 %v1780_v6, %v1780_v6  ;;  %v95_v29 = vmul.f32 %v1783_v32, %v1783_v32 }
  0xa8   :  { %v681_v17 = vadd.f32 %v675_v4, %v669_v2  ;;  %v526_v30 = vadd.f32 %v520_v22, %v514_v18  ;;  %v544_v31 = vsub.f32 %v532_v23, %v538_v25  ;;  %v246_v33 = vsel %vm234_vm14, %v1851_v57, %v1833_v63 }
  0xa9   :  { %v699_v21 = vsub.f32 %v687_v13, %v693_v5  ;;  %v1546_v16 = vsel %vm472_vm12, 1.0, %v1643_v54  ;;  %v276_v41 = vmul.f32 0.43837115, %v240_v27  ;;  %v282_v42 = vmul.f32 0.89879405, %v246_v33 }
  0xaa   :  { %vm550_vm0 = vcmp.ge.f32.partialorder %v544_v31, 0.0  ;;  %v663_v8 = vadd.f32 %v657_v28, %v585_v15  ;;  %v105_v49 = vsel %vm104_vm13, %v1816_v61, %v103_v19  ;;  %vm106_vm2 = vcmp.eq.f32.partialorder %v1816_v61, 0.0 }
  0xab   :  { %vm705_vm15 = vcmp.ge.f32.partialorder %v699_v21, 0.0  ;;  %v556_v39 = vsel %vm550_vm0, %v526_v30, %v478_v1  ;;  %v562_v40 = vsel %vm550_vm0, %v544_v31, %v484_v44  ;;  %v1552_v46 = vsel %vm550_vm0, 1.0, %v1643_v54 }
  0xac   :  { %v711_v34 = vsel %vm705_vm15, %v681_v17, %v633_v60  ;;  %v717_v35 = vsel %vm705_vm15, %v699_v21, %v639_v59  ;;  %v1563_v36 = vsel %vm705_vm15, 1.0, %v1643_v54  ;;  %v592_v63 = vmul.f32 0.9975641, %v556_v39 }
  0xad   :  { %v735_v37 = vmul.f32 2.0, %v1563_v36  ;;  %v747_v38 = vmul.f32 0.9998477, %v717_v35  ;;  %v753_v20 = vmul.f32 0.017452406, %v711_v34  ;;  %v288_v59 = vadd.f32 %v282_v42, %v276_v41 }
  0xae   :  { %v598_v47 = vmul.f32 0.06975647, %v562_v40  ;;  %v610_v48 = vmul.f32 0.9975641, %v562_v40  ;;  %v616_v9 = vmul.f32 0.06975647, %v556_v39  ;;  %v1883_v4 = vadd.f32 %v95_v29, %v89_v26 }
  0xaf   :  { %v759_v45 = vsub.f32 %v747_v38, %v753_v20  ;;  %v741_v51 = vadd.f32 %v735_v37, %v663_v8  ;;  %v294_v52 = vmul.f32 0.43837115, %v246_v33  ;;  %v300_v50 = vmul.f32 0.89879405, %v240_v27 }
  0xb0   :  { %v604_v58 = vadd.f32 %v598_v47, %v592_v63  ;;  %v622_v60 = vsub.f32 %v610_v48, %v616_v9  ;;  %vm155_vm3 = vcmp.eq.f32.partialorder %v1783_v32, 0.0  ;;  %v502_v44 = vmul.f32 4.0, %v1546_v16 }
  0xb1   :  { %vm765_vm1 = vcmp.ge.f32.partialorder %v759_v45, 0.0  ;;  %v306_v2 = vsub.f32 %v294_v52, %v300_v50  ;;  %v580_v62 = vmul.f32 8.0, %v1552_v46  ;;  %vm161_vm5 = vcmp.lt.f32.partialorder %v1780_v6, 0.0 }
  0xb2   :  { %v1569_v56 = vsel %vm765_vm1, 1.0, %v1643_v54  ;;  %vm628_vm4 = vcmp.ge.f32.partialorder %v622_v60, 0.0  ;;  %vm149_vm6 = vcmp.lt.f32.partialorder %v1783_v32, 0.0  ;;  %vm167_vm8 = vmand %vm155_vm3, %vm161_vm5  ;;  %1586 = vrsqrt.f32 %v1883_v4 }
  0xb3   :  { %v1881_v1 = vadd.f32 %v1569_v56, %v741_v51  ;;  %v634_v13 = vsel %vm628_vm4, %v604_v58, %v556_v39  ;;  %v640_v5 = vsel %vm628_vm4, %v622_v60, %v562_v40  ;;  %v1558_v15 = vsel %vm628_vm4, 1.0, %v1643_v54  ;;  %vm1897_vm9 = vmor %vm149_vm6, %vm167_vm8 }
  0xb4   :  { %v670_v17 = vmul.f32 0.99939084, %v634_v13  ;;  %v676_v18 = vmul.f32 0.034899496, %v640_v5  ;;  %vm312_vm7 = vcmp.ge.f32.partialorder %v306_v2, 0.0  ;;  %v508_v23 = vadd.f32 %v502_v44, %v1853_v0 }
  0xb5   :  { %v789_v12 = vadd.f32 0.5, %v1881_v1  ;;  %v688_v19 = vmul.f32 0.99939084, %v640_v5  ;;  %v694_v21 = vmul.f32 0.034899496, %v634_v13  ;;  %v318_v22 = vsel %vm312_vm7, %v288_v59, %v240_v27 }
  0xb6   :  { %v682_v25 = vadd.f32 %v676_v18, %v670_v17  ;;  %v324_v28 = vsel %vm312_vm7, %v306_v2, %v246_v33  ;;  %v179_v26 = vsub.f32 0.0, %v1780_v6  ;;  %v658_v30 = vmul.f32 4.0, %v1558_v15 }
  0xb7   :  { %v795_v29 = vmul.f32 0.083333336, %v789_v12  ;;  %v700_v31 = vsub.f32 %v688_v19, %v694_v21  ;;  %v354_v34 = vmul.f32 0.8480481, %v318_v22  ;;  %v1905_v0 = vsel %vm106_vm2, %v107_v55, %v105_v49 }
  0xb8   :  { %v360_v27 = vmul.f32 0.52991927, %v324_v28  ;;  %v372_v33 = vmul.f32 0.8480481, %v324_v28  ;;  %v378_v36 = vmul.f32 0.52991927, %v318_v22  ;;  %v586_v16 = vadd.f32 %v580_v62, %v508_v23 }
  0xb9   :  { %vm706_vm10 = vcmp.ge.f32.partialorder %v700_v31, 0.0  ;;  %v1524_v37 = vsel %vm234_vm14, 1.0, %v1643_v54  ;;  %v1530_v38 = vsel %vm312_vm7, 1.0, %v1643_v54  ;;  %v1916_v61 = vsel %vm1897_vm9, %v179_v26, %v1780_v6 }
  0xba   :  { %v712_v20 = vsel %vm706_vm10, %v682_v25, %v634_v13  ;;  %v718_v39 = vsel %vm706_vm10, %v700_v31, %v640_v5  ;;  %v1564_v40 = vsel %vm706_vm10, 1.0, %v1643_v54  ;;  %v366_v8 = vadd.f32 %v360_v27, %v354_v34 }
  0xbb   :  { %v736_v55 = vmul.f32 2.0, %v1564_v40  ;;  %v748_v41 = vmul.f32 0.9998477, %v718_v39  ;;  %v754_v42 = vmul.f32 0.017452406, %v712_v20  ;;  %v801_v45 = vfloor.f32 %v795_v29 }
  0xbc   :  { %v664_v46 = vadd.f32 %v658_v30, %v586_v16  ;;  %v384_v57 = vsub.f32 %v372_v33, %v378_v36  ;;  %v191_v63 = vsub.f32 0.0, %v1783_v32  ;;  %vm157_vm11 = vcmp.lt.f32.partialorder %v1745_v53, 0.0  ;;  %v1587_v52 = vpop.eup %1586 }
  0xbd   :  { %v760_v47 = vsub.f32 %v748_v41, %v754_v42  ;;  %v264_v48 = vmul.f32 8.0, %v1524_v37  ;;  %v342_v9 = vmul.f32 4.0, %v1530_v38  ;;  %vm139_vm12 = vcmp.eq.f32.partialorder %v1883_v4, inf }
  0xbe   :  { %v742_v49 = vadd.f32 %v736_v55, %v664_v46  ;;  %vm390_vm13 = vcmp.ge.f32.partialorder %v384_v57, 0.0  ;;  %v203_v6 = vmul.f32 -0.6156615, %v1916_v61  ;;  %v227_v51 = vmul.f32 0.7880108, %v1916_v61 }
  0xbf   :  { %vm766_vm14 = vcmp.ge.f32.partialorder %v760_v47, 0.0  ;;  %v396_v50 = vsel %vm390_vm13, %v366_v8, %v318_v22  ;;  %v402_v56 = vsel %vm390_vm13, %v384_v57, %v324_v28  ;;  %v197_v58 = vsel %vm1897_vm9, %v191_v63, %v1783_v32  ;;  %v65_v47 = vpop.permute.xlu1 %64 }
  0xc0   :  { %v807_v60 = vmul.f32 12.0, %v801_v45  ;;  %v1570_v59 = vsel %vm766_vm14, 1.0, %v1643_v54  ;;  %v432_v2 = vmul.f32 0.9612617, %v396_v50  ;;  %v438_v44 = vmul.f32 0.27563736, %v402_v56 }
  0xc1   :  { %vm141_vm15 = vcmp.eq.f32.partialorder %v1883_v4, 0.0  ;;  %v784_v62 = vadd.f32 %v1570_v59, %v742_v49  ;;  %v1536_v12 = vsel %vm390_vm13, 1.0, %v1643_v54  ;;  %v450_v13 = vmul.f32 0.9612617, %v402_v56 }
  0xc2   :  { %v456_v5 = vmul.f32 0.27563736, %v396_v50  ;;  %v444_v15 = vadd.f32 %v438_v44, %v432_v2  ;;  %v138_v17 = vmul.f32 %v1587_v52, %v1883_v4  ;;  %v209_v18 = vmul.f32 0.7880108, %v197_v58 }
  0xc3   :  { %v91_v19 = vmul.f32 %v1793_v43, %v1793_v43  ;;  %v790_v32 = vadd.f32 0.5, %v784_v62  ;;  %v221_v22 = vmul.f32 -0.6156615, %v197_v58  ;;  %vm151_vm0 = vcmp.eq.f32.partialorder %v1793_v43, 0.0 }
  0xc4   :  { %v462_v21 = vsub.f32 %v450_v13, %v456_v5  ;;  %v348_v23 = vadd.f32 %v342_v9, %v264_v48  ;;  %v420_v25 = vmul.f32 8.0, %v1536_v12  ;;  %v142_v28 = vand.u32 2147483648, %v1883_v4  ;;  %vm163_vm3 = vmand %vm151_vm0, %vm157_vm11 }
  0xc5   :  { %vm145_vm1 = vcmp.lt.f32.partialorder %v1793_v43, 0.0  ;;  %v796_v26 = vmul.f32 0.083333336, %v790_v32  ;;  %v215_v29 = vadd.f32 %v209_v18, %v203_v6  ;;  %v233_v30 = vsub.f32 %v221_v22, %v227_v51 }
  0xc6   :  { %vm468_vm2 = vcmp.ge.f32.partialorder %v462_v21, 0.0  ;;  %v140_v35 = vsel %vm139_vm12, %v1883_v4, %v138_v17  ;;  %v1939_v27 = vadd.f32 %v91_v19, %v1761_v3  ;;  %v1944_v33 = vsub.f32 %v1881_v1, %v807_v60  ;;  %vm1955_vm5 = vmor %vm145_vm1, %vm163_vm3 }
  0xc7   :  { %v474_v31 = vsel %vm468_vm2, %v444_v15, %v396_v50  ;;  %v480_v34 = vsel %vm468_vm2, %v462_v21, %v402_v56  ;;  %v802_v36 = vfloor.f32 %v796_v26  ;;  %v1542_v38 = vsel %vm468_vm2, 1.0, %v1643_v54 }
  0xc8   :  { %v510_v16 = vmul.f32 0.99026805, %v474_v31  ;;  %v516_v37 = vmul.f32 0.1391731, %v480_v34  ;;  %v528_v20 = vmul.f32 0.99026805, %v480_v34  ;;  %v426_v40 = vadd.f32 %v420_v25, %v348_v23 }
  0xc9   :  { %v534_v39 = vmul.f32 0.1391731, %v474_v31  ;;  %vm239_vm4 = vcmp.ge.f32.partialorder %v233_v30, 0.0  ;;  %v1949_v3 = vsel %vm141_vm15, %v142_v28, %v140_v35  ;;  %1588 = vrsqrt.f32 %v1939_v27 }
  0xca   :  { %v522_v55 = vadd.f32 %v516_v37, %v510_v16  ;;  %v245_v41 = vsel %vm239_vm4, %v215_v29, %v1916_v61  ;;  %v251_v8 = vsel %vm239_vm4, %v233_v30, %v197_v58  ;;  %v808_v46 = vmul.f32 12.0, %v802_v36 }
  0xcb   :  { %v540_v42 = vsub.f32 %v528_v20, %v534_v39  ;;  %v281_v45 = vmul.f32 0.43837115, %v245_v41  ;;  %v498_v57 = vmul.f32 4.0, %v1542_v38  ;;  %v287_v4 = vmul.f32 0.89879405, %v251_v8 }
  0xcc   :  { %v299_v63 = vmul.f32 0.43837115, %v251_v8  ;;  %v305_v48 = vmul.f32 0.89879405, %v245_v41  ;;  %v1966_v61 = vsel %vm1955_vm5, %v175_v14, %v1745_v53  ;;  %v187_v9 = vsub.f32 0.0, %v1793_v43 }
  0xcd   :  { %vm546_vm6 = vcmp.ge.f32.partialorder %v540_v42, 0.0  ;;  %v1529_v51 = vsel %vm239_vm4, 1.0, %v1643_v54  ;;  %v293_v52 = vadd.f32 %v287_v4, %v281_v45  ;;  %v1974_v60 = vsub.f32 %v1726_v10, %v65_v47 }
  0xce   :  { %v552_v49 = vsel %vm546_vm6, %v522_v55, %v474_v31  ;;  %v558_v6 = vsel %vm546_vm6, %v540_v42, %v480_v34  ;;  %v311_v58 = vsub.f32 %v299_v63, %v305_v48  ;;  %v1976_v59 = vsub.f32 %v784_v62, %v808_v46 }
  0xcf   :  { %v588_v50 = vmul.f32 0.9975641, %v552_v49  ;;  %v594_v56 = vmul.f32 0.06975647, %v558_v6  ;;  %v504_v53 = vadd.f32 %v498_v57, %v426_v40  ;;  %v606_v14 = vmul.f32 0.9975641, %v558_v6 }
  0xd0   :  { %v612_v2 = vmul.f32 0.06975647, %v552_v49  ;;  %v1548_v44 = vsel %vm546_vm6, 1.0, %v1643_v54  ;;  %v1980_v13 = vmul.f32 8.0, %v1529_v51  ;;  %vm317_vm7 = vcmp.ge.f32.partialorder %v311_v58, 0.0 }
  0xd1   :  { %v600_v12 = vadd.f32 %v594_v56, %v588_v50  ;;  %v323_v15 = vsel %vm317_vm7, %v293_v52, %v245_v41  ;;  %v329_v17 = vsel %vm317_vm7, %v311_v58, %v251_v8  ;;  %v114_v10 = vand.u32 2147483648, %v1939_v27 }
  0xd2   :  { %v618_v5 = vsub.f32 %v606_v14, %v612_v2  ;;  %v359_v18 = vmul.f32 0.8480481, %v323_v15  ;;  %v365_v62 = vmul.f32 0.52991927, %v329_v17  ;;  %v193_v19 = vsel %vm1955_vm5, %v187_v9, %v1793_v43 }
  0xd3   :  { %v199_v32 = vmul.f32 -0.6156615, %v1966_v61  ;;  %v576_v21 = vmul.f32 8.0, %v1548_v44  ;;  %v377_v22 = vmul.f32 0.8480481, %v329_v17  ;;  %vm111_vm9 = vcmp.eq.f32.partialorder %v1939_v27, inf  ;;  %v1589_v25 = vpop.eup %1588 }
  0xd4   :  { %vm624_vm8 = vcmp.ge.f32.partialorder %v618_v5, 0.0  ;;  %v383_v23 = vmul.f32 0.52991927, %v323_v15  ;;  %v1535_v29 = vsel %vm317_vm7, 1.0, %v1643_v54  ;;  %v1994_v30 = vmul.f32 %v1974_v60, %v1974_v60 }
  0xd5   :  { %v630_v28 = vsel %vm624_vm8, %v600_v12, %v552_v49  ;;  %v636_v26 = vsel %vm624_vm8, %v618_v5, %v558_v6  ;;  %v1554_v43 = vsel %vm624_vm8, 1.0, %v1643_v54  ;;  %v371_v35 = vadd.f32 %v365_v62, %v359_v18 }
  0xd6   :  { %v666_v31 = vmul.f32 0.99939084, %v630_v28  ;;  %v672_v34 = vmul.f32 0.034899496, %v636_v26  ;;  %v684_v36 = vmul.f32 0.99939084, %v636_v26  ;;  %v389_v37 = vsub.f32 %v377_v22, %v383_v23 }
  0xd7   :  { %v690_v16 = vmul.f32 0.034899496, %v630_v28  ;;  %vm113_vm10 = vcmp.eq.f32.partialorder %v1939_v27, 0.0  ;;  %v205_v38 = vmul.f32 0.7880108, %v193_v19  ;;  %v582_v20 = vadd.f32 %v576_v21, %v504_v53 }
  0xd8   :  { %v678_v39 = vadd.f32 %v672_v34, %v666_v31  ;;  %v217_v40 = vmul.f32 -0.6156615, %v193_v19  ;;  %v223_v55 = vmul.f32 0.7880108, %v1966_v61  ;;  %v347_v1 = vmul.f32 4.0, %v1535_v29 }
  0xd9   :  { %v696_v41 = vsub.f32 %v684_v36, %v690_v16  ;;  %vm395_vm11 = vcmp.ge.f32.partialorder %v389_v37, 0.0  ;;  %v110_v42 = vmul.f32 %v1589_v25, %v1939_v27  ;;  %v654_v8 = vmul.f32 4.0, %v1554_v43 }
  0xda   :  { %v401_v45 = vsel %vm395_vm11, %v371_v35, %v323_v15  ;;  %v407_v46 = vsel %vm395_vm11, %v389_v37, %v329_v17  ;;  %v229_v57 = vsub.f32 %v217_v40, %v223_v55  ;;  %v211_v47 = vadd.f32 %v205_v38, %v199_v32 }
  0xdb   :  { %vm702_vm12 = vcmp.ge.f32.partialorder %v696_v41, 0.0  ;;  %v437_v4 = vmul.f32 0.9612617, %v401_v45  ;;  %v443_v63 = vmul.f32 0.27563736, %v407_v46  ;;  %v112_v56 = vsel %vm111_vm9, %v1939_v27, %v110_v42 }
  0xdc   :  { %v708_v48 = vsel %vm702_vm12, %v678_v39, %v630_v28  ;;  %v714_v9 = vsel %vm702_vm12, %v696_v41, %v636_v26  ;;  %v1560_v49 = vsel %vm702_vm12, 1.0, %v1643_v54  ;;  %v455_v6 = vmul.f32 0.9612617, %v407_v46 }
  0xdd   :  { %v732_v51 = vmul.f32 2.0, %v1560_v49  ;;  %v744_v52 = vmul.f32 0.9998477, %v714_v9  ;;  %v750_v50 = vmul.f32 0.017452406, %v708_v48  ;;  %v660_v58 = vadd.f32 %v654_v8, %v582_v20 }
  0xde   :  { %v1541_v53 = vsel %vm395_vm11, 1.0, %v1643_v54  ;;  %v461_v14 = vmul.f32 0.27563736, %v401_v45  ;;  %vm235_vm13 = vcmp.ge.f32.partialorder %v229_v57, 0.0  ;;  %v449_v44 = vadd.f32 %v443_v63, %v437_v4 }
  0xdf   :  { %v756_v2 = vsub.f32 %v744_v52, %v750_v50  ;;  %v241_v12 = vsel %vm235_vm13, %v211_v47, %v1966_v61  ;;  %v247_v5 = vsel %vm235_vm13, %v229_v57, %v193_v19  ;;  %v2013_v17 = vsel %vm113_vm10, %v114_v10, %v112_v56  ;;  %v35_v61 = vpop.permute.xlu0 %34 }
  0xe0   :  { %v467_v15 = vsub.f32 %v455_v6, %v461_v14  ;;  %v277_v18 = vmul.f32 0.43837115, %v241_v12  ;;  %v283_v62 = vmul.f32 0.89879405, %v247_v5  ;;  %v738_v32 = vadd.f32 %v732_v51, %v660_v58 }
  0xe1   :  { %vm762_vm14 = vcmp.ge.f32.partialorder %v756_v2, 0.0  ;;  %v295_v21 = vmul.f32 0.43837115, %v247_v5  ;;  %v301_v22 = vmul.f32 0.89879405, %v241_v12  ;;  %v353_v25 = vadd.f32 %v347_v1, %v1980_v13 }
  0xe2   :  { %v1566_v23 = vsel %vm762_vm14, 1.0, %v1643_v54  ;;  %v425_v28 = vmul.f32 8.0, %v1541_v53  ;;  %vm473_vm15 = vcmp.ge.f32.partialorder %v467_v15, 0.0  ;;  %v289_v43 = vadd.f32 %v283_v62, %v277_v18 }
  0xe3   :  { %v780_v26 = vadd.f32 %v1566_v23, %v738_v32  ;;  %v479_v19 = vsel %vm473_vm15, %v449_v44, %v401_v45  ;;  %v485_v29 = vsel %vm473_vm15, %v467_v15, %v407_v46  ;;  %v1547_v27 = vsel %vm473_vm15, 1.0, %v1643_v54 }
  0xe4   :  { %v515_v10 = vmul.f32 0.99026805, %v479_v19  ;;  %v521_v31 = vmul.f32 0.1391731, %v485_v29  ;;  %v307_v34 = vsub.f32 %v295_v21, %v301_v22  ;;  %v533_v36 = vmul.f32 0.99026805, %v485_v29 }
  0xe5   :  { %v786_v35 = vadd.f32 0.5, %v780_v26  ;;  %v539_v16 = vmul.f32 0.1391731, %v479_v19  ;;  %vm146_vm0 = vcmp.lt.f32.partialorder %v1974_v60, 0.0  ;;  %v50_v37 = vsub.f32 %v1731_v11, %v35_v61 }
  0xe6   :  { %v527_v13 = vadd.f32 %v521_v31, %v515_v10  ;;  %v1525_v38 = vsel %vm235_vm13, 1.0, %v1643_v54  ;;  %vm313_vm1 = vcmp.ge.f32.partialorder %v307_v34, 0.0  ;;  %vm152_vm2 = vcmp.eq.f32.partialorder %v1974_v60, 0.0 }
  0xe7   :  { %v792_v20 = vmul.f32 0.083333336, %v786_v35  ;;  %v545_v39 = vsub.f32 %v533_v36, %v539_v16  ;;  %v319_v40 = vsel %vm313_vm1, %v289_v43, %v241_v12  ;;  %v325_v55 = vsel %vm313_vm1, %v307_v34, %v247_v5 }
  0xe8   :  { %v503_v41 = vmul.f32 4.0, %v1547_v27  ;;  %v1531_v1 = vsel %vm313_vm1, 1.0, %v1643_v54  ;;  %v355_v42 = vmul.f32 0.8480481, %v319_v40  ;;  %v361_v8 = vmul.f32 0.52991927, %v325_v55 }
  0xe9   :  { %v798_v45 = vfloor.f32 %v792_v20  ;;  %vm551_vm3 = vcmp.ge.f32.partialorder %v545_v39, 0.0  ;;  %v343_v46 = vmul.f32 4.0, %v1531_v1  ;;  %v86_v11 = vmul.f32 %v50_v37, %v50_v37 }
  0xea   :  { %v557_v4 = vsel %vm551_vm3, %v527_v13, %v479_v19  ;;  %v563_v63 = vsel %vm551_vm3, %v545_v39, %v485_v29  ;;  %v1553_v57 = vsel %vm551_vm3, 1.0, %v1643_v54  ;;  %v373_v47 = vmul.f32 0.8480481, %v325_v55 }
  0xeb   :  { %v804_v48 = vmul.f32 12.0, %v798_v45  ;;  %v581_v9 = vmul.f32 8.0, %v1553_v57  ;;  %v593_v49 = vmul.f32 0.9975641, %v557_v4  ;;  %v599_v6 = vmul.f32 0.06975647, %v563_v63 }
  0xec   :  { %v431_v51 = vadd.f32 %v425_v28, %v353_v25  ;;  %v611_v52 = vmul.f32 0.9975641, %v563_v63  ;;  %v617_v50 = vmul.f32 0.06975647, %v557_v4  ;;  %v379_v56 = vmul.f32 0.52991927, %v319_v40 }
  0xed   :  { %v605_v58 = vadd.f32 %v599_v6, %v593_v49  ;;  %v265_v53 = vmul.f32 8.0, %v1525_v38  ;;  %v367_v14 = vadd.f32 %v361_v8, %v355_v42  ;;  %v2026_v2 = vadd.f32 %v1994_v30, %v86_v11 }
  0xee   :  { %v509_v44 = vadd.f32 %v503_v41, %v431_v51  ;;  %v623_v12 = vsub.f32 %v611_v52, %v617_v50  ;;  %v385_v5 = vsub.f32 %v373_v47, %v379_v56  ;;  %vm158_vm4 = vcmp.lt.f32.partialorder %v50_v37, 0.0 }
  0xef   :  { %v2028_v15 = vadd.f32 %v343_v46, %v265_v53  ;;  %v188_v18 = vsub.f32 0.0, %v1974_v60  ;;  %1590 = vrsqrt.f32 %v2026_v2  ;;  %vm164_vm5 = vmand %vm152_vm2, %vm158_vm4  ;;  %v176_v62 = vsub.f32 0.0, %v50_v37 }
  0xf0   :  { %v2034_v32 = vsub.f32 %v780_v26, %v804_v48  ;;  %v587_v21 = vadd.f32 %v581_v9, %v509_v44  ;;  %vm629_vm6 = vcmp.ge.f32.partialorder %v623_v12, 0.0  ;;  %vm391_vm7 = vcmp.ge.f32.partialorder %v385_v5, 0.0  ;;  %vm2038_vm8 = vmor %vm146_vm0, %vm164_vm5 }
  0xf1   :  { %v635_v22 = vsel %vm629_vm6, %v605_v58, %v557_v4  ;;  %v641_v23 = vsel %vm629_vm6, %v623_v12, %v563_v63  ;;  %v1559_v25 = vsel %vm629_vm6, 1.0, %v1643_v54  ;;  %v397_v28 = vsel %vm391_vm7, %v367_v14, %v319_v40 }
  0xf2   :  { %v671_v61 = vmul.f32 0.99939084, %v635_v22  ;;  %v677_v19 = vmul.f32 0.034899496, %v641_v23  ;;  %v403_v29 = vsel %vm391_vm7, %v385_v5, %v325_v55  ;;  %v121_v26 = vand.u32 2147483648, %v2026_v2 }
  0xf3   :  { %v689_v43 = vmul.f32 0.99939084, %v641_v23  ;;  %v695_v27 = vmul.f32 0.034899496, %v635_v22  ;;  %v1537_v10 = vsel %vm391_vm7, 1.0, %v1643_v54  ;;  %vm118_vm9 = vcmp.eq.f32.partialorder %v2026_v2, inf }
  0xf4   :  { %v2048_v31 = vsel %vm2038_vm8, %v176_v62, %v50_v37  ;;  %v659_v34 = vmul.f32 4.0, %v1559_v25  ;;  %v683_v35 = vadd.f32 %v677_v19, %v671_v61  ;;  %v433_v36 = vmul.f32 0.9612617, %v397_v28 }
  0xf5   :  { %vm868_vm10 = vcmp.eq.f32.partialorder %v1944_v33, 1.0  ;;  %v701_v16 = vsub.f32 %v689_v43, %v695_v27  ;;  %v439_v13 = vmul.f32 0.27563736, %v403_v29  ;;  %v451_v38 = vmul.f32 0.9612617, %v403_v29 }
  0xf6   :  { %v457_v20 = vmul.f32 0.27563736, %v397_v28  ;;  %vm869_vm11 = vcmp.eq.f32.partialorder %v1976_v59, 1.0  ;;  %v421_v39 = vmul.f32 8.0, %v1537_v10  ;;  %vm120_vm12 = vcmp.eq.f32.partialorder %v2026_v2, 0.0 }
  0xf7   :  { %v194_v40 = vsel %vm2038_vm8, %v188_v18, %v1974_v60  ;;  %v200_v37 = vmul.f32 -0.6156615, %v2048_v31  ;;  %v224_v55 = vmul.f32 0.7880108, %v2048_v31  ;;  %vm707_vm13 = vcmp.ge.f32.partialorder %v701_v16, 0.0 }
  0xf8   :  { %v445_v41 = vadd.f32 %v439_v13, %v433_v36  ;;  %v463_v1 = vsub.f32 %v451_v38, %v457_v20  ;;  %v206_v42 = vmul.f32 0.7880108, %v194_v40  ;;  %v713_v8 = vsel %vm707_vm13, %v683_v35, %v635_v22 }
  0xf9   :  { %v719_v45 = vsel %vm707_vm13, %v701_v16, %v641_v23  ;;  %v1565_v46 = vsel %vm707_vm13, 1.0, %v1643_v54  ;;  %v218_v11 = vmul.f32 -0.6156615, %v194_v40  ;;  %v1591_v4 = vpop.eup %1590  ;;  %v755_v47 = vmul.f32 0.017452406, %v713_v8 }
  0xfa   :  { %v737_v63 = vmul.f32 2.0, %v1565_v46  ;;  %v749_v57 = vmul.f32 0.9998477, %v719_v45  ;;  %vm469_vm14 = vcmp.ge.f32.partialorder %v463_v1, 0.0  ;;  %vm828_vm15 = vcmask 130056  }
  0xfb   :  { %v475_v60 = vsel %vm469_vm14, %v445_v41, %v397_v28  ;;  %v481_v48 = vsel %vm469_vm14, %v463_v1, %v403_v29  ;;  %v1543_v9 = vsel %vm469_vm14, 1.0, %v1643_v54  ;;  %v117_v49 = vmul.f32 %v1591_v4, %v2026_v2 }
  0xfc   :  { %v665_v6 = vadd.f32 %v659_v34, %v587_v21  ;;  %v761_v51 = vsub.f32 %v749_v57, %v755_v47  ;;  %v499_v52 = vmul.f32 4.0, %v1543_v9  ;;  %v511_v50 = vmul.f32 0.99026805, %v475_v60 }
  0xfd   :  { %v517_v56 = vmul.f32 0.1391731, %v481_v48  ;;  %v529_v58 = vmul.f32 0.99026805, %v481_v48  ;;  %v535_v53 = vmul.f32 0.1391731, %v475_v60  ;;  %v119_v14 = vsel %vm118_vm9, %v2026_v2, %v117_v49 }
  0xfe   :  { %v743_v44 = vadd.f32 %v737_v63, %v665_v6  ;;  %vm767_vm0 = vcmp.ge.f32.partialorder %v761_v51, 0.0  ;;  %v427_v12 = vadd.f32 %v421_v39, %v2028_v15  ;;  %v212_v5 = vadd.f32 %v206_v42, %v200_v37 }
  0xff   :  { %v1571_v18 = vsel %vm767_vm0, 1.0, %v1643_v54  ;;  %v523_v62 = vadd.f32 %v517_v56, %v511_v50  ;;  %v541_v30 = vsub.f32 %v529_v58, %v535_v53  ;;  %v230_v21 = vsub.f32 %v218_v11, %v224_v55 }
 0x100   :  { %v785_v22 = vadd.f32 %v1571_v18, %v743_v44  ;;  %v505_v23 = vadd.f32 %v499_v52, %v427_v12  ;;  %v2068_v25 = vsel %vm120_vm12, %v121_v26, %v119_v14  ;;  %v874_v28 = vsel %vm868_vm10, %v1790_v7, 0.0 }
 0x101   :  { %vm547_vm1 = vcmp.ge.f32.partialorder %v541_v30, 0.0  ;;  %vm236_vm2 = vcmp.ge.f32.partialorder %v230_v21, 0.0  ;;  %v875_v15 = vsel %vm869_vm11, %v1848_v24, 0.0  ;;  %vm819_vm3 = vcmp.eq.f32.partialorder %v1944_v33, 0.0 }
 0x102   :  { %v791_v61 = vadd.f32 0.5, %v785_v22  ;;  %v553_v19 = vsel %vm547_vm1, %v523_v62, %v475_v60  ;;  %v559_v29 = vsel %vm547_vm1, %v541_v30, %v481_v48  ;;  %v1549_v43 = vsel %vm547_vm1, 1.0, %v1643_v54 }
 0x103   :  { %v577_v2 = vmul.f32 8.0, %v1549_v43  ;;  %v589_v26 = vmul.f32 0.9975641, %v553_v19  ;;  %v595_v27 = vmul.f32 0.06975647, %v559_v29  ;;  %v242_v10 = vsel %vm236_vm2, %v212_v5, %v2048_v31 }
 0x104   :  { %v797_v34 = vmul.f32 0.083333336, %v791_v61  ;;  %v607_v35 = vmul.f32 0.9975641, %v559_v29  ;;  %v613_v36 = vmul.f32 0.06975647, %v553_v19  ;;  %v248_v16 = vsel %vm236_vm2, %v230_v21, %v194_v40 }
 0x105   :  { %v601_v13 = vadd.f32 %v595_v27, %v589_v26  ;;  %v1526_v38 = vsel %vm236_vm2, 1.0, %v1643_v54  ;;  %v278_v20 = vmul.f32 0.43837115, %v242_v10  ;;  %v888_v39 = vsel %vm828_vm15, %v874_v28, 0.0 }
 0x106   :  { %v803_v37 = vfloor.f32 %v797_v34  ;;  %v619_v55 = vsub.f32 %v607_v35, %v613_v36  ;;  %v284_v41 = vmul.f32 0.89879405, %v248_v16  ;;  %v889_v1 = vsel %vm828_vm15, %v875_v15, 0.0 }
 0x107   :  { %v583_v42 = vadd.f32 %v577_v2, %v505_v23  ;;  %v2085_v8 = vmul.f32 8.0, %v1526_v38  ;;  %v296_v31 = vmul.f32 0.43837115, %v248_v16  ;;  %v302_v45 = vmul.f32 0.89879405, %v242_v10 }
 0x108   :  { %v809_v46 = vmul.f32 12.0, %v803_v37  ;;  %vm625_vm4 = vcmp.ge.f32.partialorder %v619_v55, 0.0  ;;  %v290_v40 = vadd.f32 %v284_v41, %v278_v20  ;;  %vm820_vm5 = vcmp.eq.f32.partialorder %v1976_v59, 0.0 }
 0x109   :  { %v631_v11 = vsel %vm625_vm4, %v601_v13, %v553_v19  ;;  %v637_v4 = vsel %vm625_vm4, %v619_v55, %v559_v29  ;;  %v1555_v63 = vsel %vm625_vm4, 1.0, %v1643_v54  ;;  %v308_v57 = vsub.f32 %v296_v31, %v302_v45 }
 0x10a   :  { %v2089_v47 = vsub.f32 %v785_v22, %v809_v46  ;;  %v655_v60 = vmul.f32 4.0, %v1555_v63  ;;  %v667_v48 = vmul.f32 0.99939084, %v631_v11  ;;  %v673_v9 = vmul.f32 0.034899496, %v637_v4 }
 0x10b   :  { %v685_v49 = vmul.f32 0.99939084, %v637_v4  ;;  %v691_v6 = vmul.f32 0.034899496, %v631_v11  ;;  %vm314_vm6 = vcmp.ge.f32.partialorder %v308_v57, 0.0  ;;  %v890_v51 = vadd.f32 %v889_v1, %v888_v39 }
 0x10c   :  { %v679_v52 = vadd.f32 %v673_v9, %v667_v48  ;;  %v320_v50 = vsel %vm314_vm6, %v290_v40, %v242_v10  ;;  %v326_v56 = vsel %vm314_vm6, %v308_v57, %v248_v16  ;;  %v825_v58 = vsel %vm819_vm3, %v1790_v7, 0.0 }
 0x10d   :  { %v697_v53 = vsub.f32 %v685_v49, %v691_v6  ;;  %v356_v14 = vmul.f32 0.8480481, %v320_v50  ;;  %v362_v44 = vmul.f32 0.52991927, %v326_v56  ;;  %v826_v12 = vsel %vm820_vm5, %v1848_v24, 0.0 }
 0x10e   :  { %v661_v5 = vadd.f32 %v655_v60, %v583_v42  ;;  %v374_v18 = vmul.f32 0.8480481, %v326_v56  ;;  %v380_v62 = vmul.f32 0.52991927, %v320_v50  ;;  %vm870_vm7 = vcmp.eq.f32.partialorder %v2089_v47, 1.0 }
 0x10f   :  { %vm703_vm8 = vcmp.ge.f32.partialorder %v697_v53, 0.0  ;;  %v1532_v30 = vsel %vm314_vm6, 1.0, %v1643_v54  ;;  %v876_v21 = vsel %vm870_vm7, %v1949_v3, 0.0  ;;  %vm821_vm9 = vcmp.eq.f32.partialorder %v2089_v47, 0.0 }
 0x110   :  { %v709_v22 = vsel %vm703_vm8, %v679_v52, %v631_v11  ;;  %v715_v23 = vsel %vm703_vm8, %v697_v53, %v637_v4  ;;  %v1561_v28 = vsel %vm703_vm8, 1.0, %v1643_v54  ;;  %v368_v15 = vadd.f32 %v362_v44, %v356_v14 }
 0x111   :  { %v733_v61 = vmul.f32 2.0, %v1561_v28  ;;  %v745_v19 = vmul.f32 0.9998477, %v715_v23  ;;  %v751_v29 = vmul.f32 0.017452406, %v709_v22  ;;  %v386_v43 = vsub.f32 %v374_v18, %v380_v62 }
 0x112   :  { %v344_v2 = vmul.f32 4.0, %v1532_v30  ;;  %v891_v26 = vsel %vm828_vm15, %v876_v21, 0.0  ;;  %v827_v27 = vsel %vm821_vm9, %v1949_v3, 0.0  ;;  %v841_v10 = vsel %vm828_vm15, %v826_v12, 0.0 }
 0x113   :  { %v757_v34 = vsub.f32 %v745_v19, %v751_v29  ;;  %vm392_vm10 = vcmp.ge.f32.partialorder %v386_v43, 0.0  ;;  %v892_v35 = vadd.f32 %v891_v26, %v890_v51  ;;  %v840_v36 = vsel %vm828_vm15, %v825_v58, 0.0 }
 0x114   :  { %v739_v16 = vadd.f32 %v733_v61, %v661_v5  ;;  %v398_v13 = vsel %vm392_vm10, %v368_v15, %v320_v50  ;;  %v404_v38 = vsel %vm392_vm10, %v386_v43, %v326_v56  ;;  %v1538_v20 = vsel %vm392_vm10, 1.0, %v1643_v54 }
 0x115   :  { %vm763_vm11 = vcmp.ge.f32.partialorder %v757_v34, 0.0  ;;  %v434_v39 = vmul.f32 0.9612617, %v398_v13  ;;  %v440_v37 = vmul.f32 0.27563736, %v404_v38  ;;  %v842_v55 = vadd.f32 %v841_v10, %v840_v36 }
 0x116   :  { %v1567_v41 = vsel %vm763_vm11, 1.0, %v1643_v54  ;;  %v452_v1 = vmul.f32 0.9612617, %v404_v38  ;;  %v458_v42 = vmul.f32 0.27563736, %v398_v13  ;;  %v893_v31 = vrot.slane %v892_v35, 4 }
 0x117   :  { %v781_v45 = vadd.f32 %v1567_v41, %v739_v16  ;;  %v350_v46 = vadd.f32 %v344_v2, %v2085_v8  ;;  %v446_v40 = vadd.f32 %v440_v37, %v434_v39  ;;  %v843_v11 = vsel %vm828_vm15, %v827_v27, 0.0 }
 0x118   :  { %v464_v4 = vsub.f32 %v452_v1, %v458_v42  ;;  %v894_v63 = vadd.f32 %v893_v31, %v892_v35  ;;  %v844_v57 = vadd.f32 %v843_v11, %v842_v55  ;;  %vm865_vm12 = vcmp.eq.f32.partialorder %v2034_v32, 1.0 }
 0x119   :  { %v787_v60 = vadd.f32 0.5, %v781_v45  ;;  %v422_v48 = vmul.f32 8.0, %v1538_v20  ;;  %v871_v9 = vsel %vm865_vm12, %v1905_v0, 0.0  ;;  %vm816_vm13 = vcmp.eq.f32.partialorder %v2034_v32, 0.0 }
 0x11a   :  { %vm470_vm14 = vcmp.ge.f32.partialorder %v464_v4, 0.0  ;;  %v895_v49 = vrot.slane %v894_v63, 2  ;;  %v845_v6 = vrot.slane %v844_v57, 4  ;;  %vm913_vm0 = vcmp.eq.f32.partialorder %v2034_v32, 2.0 }
 0x11b   :  { %v793_v8 = vmul.f32 0.083333336, %v787_v60  ;;  %v476_v51 = vsel %vm470_vm14, %v446_v40, %v398_v13  ;;  %v482_v52 = vsel %vm470_vm14, %v464_v4, %v404_v38  ;;  %v1544_v50 = vsel %vm470_vm14, 1.0, %v1643_v54 }
 0x11c   :  { %v500_v56 = vmul.f32 4.0, %v1544_v50  ;;  %v512_v58 = vmul.f32 0.99026805, %v476_v51  ;;  %v518_v53 = vmul.f32 0.1391731, %v482_v52  ;;  %v896_v14 = vadd.f32 %v895_v49, %v894_v63 }
 0x11d   :  { %v799_v44 = vfloor.f32 %v793_v8  ;;  %v530_v12 = vmul.f32 0.99026805, %v482_v52  ;;  %v536_v5 = vmul.f32 0.1391731, %v476_v51  ;;  %v846_v18 = vadd.f32 %v845_v6, %v844_v57 }
 0x11e   :  { %v428_v62 = vadd.f32 %v422_v48, %v350_v46  ;;  %v524_v30 = vadd.f32 %v518_v53, %v512_v58  ;;  %v897_v21 = vrot.slane %v896_v14, 1  ;;  %v822_v22 = vsel %vm816_vm13, %v1905_v0, 0.0 }
 0x11f   :  { %v805_v23 = vmul.f32 12.0, %v799_v44  ;;  %v542_v28 = vsub.f32 %v530_v12, %v536_v5  ;;  %v847_v15 = vrot.slane %v846_v18, 2  ;;  %v877_v61 = vsel %vm828_vm15, %v871_v9, 0.0 }
 0x120   :  { %v506_v19 = vadd.f32 %v500_v56, %v428_v62  ;;  %v2119_v29 = vadd.f32 %v897_v21, %v896_v14  ;;  %v829_v43 = vsel %vm828_vm15, %v822_v22, 0.0  ;;  %v919_v2 = vsel %vm913_vm0, %v1905_v0, 0.0 }
 0x121   :  { %v2125_v26 = vsub.f32 %v781_v45, %v805_v23  ;;  %vm548_vm1 = vcmp.ge.f32.partialorder %v542_v28, 0.0  ;;  %v848_v27 = vadd.f32 %v847_v15, %v846_v18  ;;  %vm916_vm2 = vcmp.eq.f32.partialorder %v1944_v33, 2.0 }
 0x122   :  { %v554_v10 = vsel %vm548_vm1, %v524_v30, %v476_v51  ;;  %v560_v34 = vsel %vm548_vm1, %v542_v28, %v482_v52  ;;  %v1550_v35 = vsel %vm548_vm1, 1.0, %v1643_v54  ;;  %903 = vrot.lane.b32.xlu1 %v2119_v29, %s1642_s13  ;;  %vm917_vm3 = vcmp.eq.f32.partialorder %v1976_v59, 2.0 }
 0x123   :  { %v578_v36 = vmul.f32 8.0, %v1550_v35  ;;  %v590_v16 = vmul.f32 0.9975641, %v554_v10  ;;  %v596_v13 = vmul.f32 0.06975647, %v560_v34  ;;  %v849_v38 = vrot.slane %v848_v27, 1 }
 0x124   :  { %v608_v20 = vmul.f32 0.9975641, %v560_v34  ;;  %v614_v39 = vmul.f32 0.06975647, %v554_v10  ;;  %vm866_vm4 = vcmp.eq.f32.partialorder %v2125_v26, 1.0  ;;  %vm817_vm5 = vcmp.eq.f32.partialorder %v2125_v26, 0.0 }
 0x125   :  { %v602_v37 = vadd.f32 %v596_v13, %v590_v16  ;;  %v2134_v55 = vadd.f32 %v849_v38, %v848_v27  ;;  %v872_v41 = vsel %vm866_vm4, %v2013_v17, 0.0  ;;  %v2138_v1 = vsel %vm828_vm15, %v919_v2, 0.0 }
 0x126   :  { %v620_v42 = vsub.f32 %v608_v20, %v614_v39  ;;  %v878_v31 = vsel %vm828_vm15, %v872_v41, 0.0  ;;  %v823_v45 = vsel %vm817_vm5, %v2013_v17, 0.0  ;;  %vm914_vm6 = vcmp.eq.f32.partialorder %v2125_v26, 2.0 }
 0x127   :  { %v584_v46 = vadd.f32 %v578_v36, %v506_v19  ;;  %855 = vrot.lane.b32.xlu0 %v2134_v55, %s1642_s13  ;;  %v2145_v40 = vadd.f32 %v878_v31, %v877_v61  ;;  %v830_v11 = vsel %vm828_vm15, %v823_v45, 0.0  ;;  %vm918_vm7 = vcmp.eq.f32.partialorder %v2089_v47, 2.0 }
 0x128   :  { %vm626_vm8 = vcmp.ge.f32.partialorder %v620_v42, 0.0  ;;  %v920_v4 = vsel %vm914_vm6, %v2013_v17, 0.0  ;;  %v922_v63 = vsel %vm916_vm2, %v1790_v7, 0.0  ;;  %v923_v57 = vsel %vm917_vm3, %v1848_v24, 0.0 }
 0x129   :  { %v632_v60 = vsel %vm626_vm8, %v602_v37, %v554_v10  ;;  %v638_v48 = vsel %vm626_vm8, %v620_v42, %v560_v34  ;;  %v1556_v9 = vsel %vm626_vm8, 1.0, %v1643_v54  ;;  %v2157_v49 = vadd.f32 %v830_v11, %v829_v43 }
 0x12a   :  { %v656_v6 = vmul.f32 4.0, %v1556_v9  ;;  %v668_v8 = vmul.f32 0.99939084, %v632_v60  ;;  %v674_v51 = vmul.f32 0.034899496, %v638_v48  ;;  %v924_v52 = vsel %vm918_vm7, %v1949_v3, 0.0 }
 0x12b   :  { %v686_v50 = vmul.f32 0.99939084, %v638_v48  ;;  %v692_v56 = vmul.f32 0.034899496, %v632_v60  ;;  %v936_v58 = vsel %vm828_vm15, %v922_v63, 0.0  ;;  %v937_v53 = vsel %vm828_vm15, %v923_v57, 0.0 }
 0x12c   :  { %v680_v14 = vadd.f32 %v674_v51, %v668_v8  ;;  %v926_v44 = vsel %vm828_vm15, %v920_v4, 0.0  ;;  %v938_v12 = vadd.f32 %v937_v53, %v936_v58  ;;  %v939_v5 = vsel %vm828_vm15, %v924_v52, 0.0 }
 0x12d   :  { %v662_v18 = vadd.f32 %v656_v6, %v584_v46  ;;  %v698_v62 = vsub.f32 %v686_v50, %v692_v56  ;;  %vm961_vm9 = vcmp.eq.f32.partialorder %v2034_v32, 3.0  ;;  %vm962_vm10 = vcmp.eq.f32.partialorder %v2125_v26, 3.0 }
 0x12e   :  { %v940_v30 = vadd.f32 %v939_v5, %v938_v12  ;;  %v967_v21 = vsel %vm961_vm9, %v1905_v0, 0.0  ;;  %v968_v22 = vsel %vm962_vm10, %v2013_v17, 0.0  ;;  %vm964_vm11 = vcmp.eq.f32.partialorder %v1944_v33, 3.0 }
 0x12f   :  { %vm704_vm12 = vcmp.ge.f32.partialorder %v698_v62, 0.0  ;;  %v973_v23 = vsel %vm828_vm15, %v967_v21, 0.0  ;;  %vm965_vm13 = vcmp.eq.f32.partialorder %v1976_v59, 3.0  ;;  %vm966_vm14 = vcmp.eq.f32.partialorder %v2089_v47, 3.0 }
 0x130   :  { %v710_v28 = vsel %vm704_vm12, %v680_v14, %v632_v60  ;;  %v716_v15 = vsel %vm704_vm12, %v698_v62, %v638_v48  ;;  %v1562_v61 = vsel %vm704_vm12, 1.0, %v1643_v54  ;;  %v941_v19 = vrot.slane %v940_v30, 4 }
 0x131   :  { %v734_v43 = vmul.f32 2.0, %v1562_v61  ;;  %v746_v2 = vmul.f32 0.9998477, %v716_v15  ;;  %v752_v27 = vmul.f32 0.017452406, %v710_v28  ;;  %v974_v10 = vsel %vm828_vm15, %v968_v22, 0.0 }
 0x132   :  { %v942_v34 = vadd.f32 %v941_v19, %v940_v30  ;;  %v970_v35 = vsel %vm964_vm11, %v1790_v7, 0.0  ;;  %v971_v36 = vsel %vm965_vm13, %v1848_v24, 0.0  ;;  %v972_v16 = vsel %vm966_vm14, %v1949_v3, 0.0 }
 0x133   :  { %v740_v13 = vadd.f32 %v734_v43, %v662_v18  ;;  %v758_v38 = vsub.f32 %v746_v2, %v752_v27  ;;  %v984_v20 = vsel %vm828_vm15, %v970_v35, 0.0  ;;  %v985_v39 = vsel %vm828_vm15, %v971_v36, 0.0 }
 0x134   :  { %v943_v37 = vrot.slane %v942_v34, 2  ;;  %v986_v41 = vadd.f32 %v985_v39, %v984_v20  ;;  %v987_v42 = vsel %vm828_vm15, %v972_v16, 0.0  ;;  %vm1009_vm0 = vcmp.eq.f32.partialorder %v2034_v32, 4.0 }
 0x135   :  { %vm764_vm1 = vcmp.ge.f32.partialorder %v758_v38, 0.0  ;;  %vm1010_vm2 = vcmp.eq.f32.partialorder %v2125_v26, 4.0  ;;  %v1015_v31 = vsel %vm1009_vm0, %v1905_v0, 0.0  ;;  %vm1012_vm3 = vcmp.eq.f32.partialorder %v1944_v33, 4.0 }
 0x136   :  { %v1568_v45 = vsel %vm764_vm1, 1.0, %v1643_v54  ;;  %v944_v46 = vadd.f32 %v943_v37, %v942_v34  ;;  %v988_v11 = vadd.f32 %v987_v42, %v986_v41  ;;  %v1016_v4 = vsel %vm1010_vm2, %v2013_v17, 0.0 }
 0x137   :  { %v782_v63 = vadd.f32 %v1568_v45, %v740_v13  ;;  %v927_v57 = vadd.f32 %v926_v44, %v2138_v1  ;;  %v975_v60 = vadd.f32 %v974_v10, %v973_v23  ;;  %vm1013_vm4 = vcmp.eq.f32.partialorder %v1976_v59, 4.0 }
 0x138   :  { %v989_v48 = vrot.slane %v988_v11, 4  ;;  %v1021_v9 = vsel %vm828_vm15, %v1015_v31, 0.0  ;;  %v1022_v6 = vsel %vm828_vm15, %v1016_v4, 0.0  ;;  %vm1014_vm5 = vcmp.eq.f32.partialorder %v2089_v47, 4.0 }
 0x139   :  { %v788_v8 = vadd.f32 0.5, %v782_v63  ;;  %v1018_v54 = vsel %vm1012_vm3, %v1790_v7, 0.0  ;;  %v1019_v51 = vsel %vm1013_vm4, %v1848_v24, 0.0  ;;  %v1020_v52 = vsel %vm1014_vm5, %v1949_v3, 0.0 }
 0x13a   :  { %v945_v50 = vrot.slane %v944_v46, 1  ;;  %v990_v56 = vadd.f32 %v989_v48, %v988_v11  ;;  %v1032_v1 = vsel %vm828_vm15, %v1018_v54, 0.0  ;;  %v1033_v58 = vsel %vm828_vm15, %v1019_v51, 0.0 }
 0x13b   :  { %v794_v53 = vmul.f32 0.083333336, %v788_v8  ;;  %v1034_v14 = vadd.f32 %v1033_v58, %v1032_v1  ;;  %v1035_v44 = vsel %vm828_vm15, %v1020_v52, 0.0  ;;  %vm1057_vm6 = vcmp.eq.f32.partialorder %v2034_v32, 5.0 }
 0x13c   :  { %v991_v12 = vrot.slane %v990_v56, 2  ;;  %v2198_v5 = vadd.f32 %v1022_v6, %v1021_v9  ;;  %vm1058_vm7 = vcmp.eq.f32.partialorder %v2125_v26, 5.0  ;;  %vm1060_vm8 = vcmp.eq.f32.partialorder %v1944_v33, 5.0 }
 0x13d   :  { %v800_v18 = vfloor.f32 %v794_v53  ;;  %v1036_v62 = vadd.f32 %v1035_v44, %v1034_v14  ;;  %v1063_v30 = vsel %vm1057_vm6, %v1905_v0, 0.0  ;;  %v1064_v21 = vsel %vm1058_vm7, %v2013_v17, 0.0 }
 0x13e   :  { %v992_v22 = vadd.f32 %v991_v12, %v990_v56  ;;  %v1070_v23 = vsel %vm828_vm15, %v1064_v21, 0.0  ;;  %vm1061_vm9 = vcmp.eq.f32.partialorder %v1976_v59, 5.0  ;;  %vm1062_vm10 = vcmp.eq.f32.partialorder %v2089_v47, 5.0 }
 0x13f   :  { %v806_v28 = vmul.f32 12.0, %v800_v18  ;;  %v2207_v15 = vadd.f32 %v945_v50, %v944_v46  ;;  %v1037_v61 = vrot.slane %v1036_v62, 4  ;;  %v1066_v19 = vsel %vm1060_vm8, %v1790_v7, 0.0 }
 0x140   :  { %v993_v43 = vrot.slane %v992_v22, 1  ;;  %v1069_v2 = vsel %vm828_vm15, %v1063_v30, 0.0  ;;  %v1067_v27 = vsel %vm1061_vm9, %v1848_v24, 0.0  ;;  %v1068_v10 = vsel %vm1062_vm10, %v1949_v3, 0.0 }
 0x141   :  { %v2213_v34 = vsub.f32 %v782_v63, %v806_v28  ;;  %v1071_v35 = vadd.f32 %v1070_v23, %v1069_v2  ;;  %v1080_v36 = vsel %vm828_vm15, %v1066_v19, 0.0  ;;  %v1081_v16 = vsel %vm828_vm15, %v1067_v27, 0.0 }
 0x142   :  { %v2217_v13 = vadd.f32 %v993_v43, %v992_v22  ;;  %v1038_v38 = vadd.f32 %v1037_v61, %v1036_v62  ;;  %v1082_v20 = vadd.f32 %v1081_v16, %v1080_v36  ;;  %v1083_v39 = vsel %vm828_vm15, %v1068_v10, 0.0 }
 0x143   :  { %vm867_vm11 = vcmp.eq.f32.partialorder %v2213_v34, 1.0  ;;  %vm818_vm12 = vcmp.eq.f32.partialorder %v2213_v34, 0.0  ;;  %vm915_vm13 = vcmp.eq.f32.partialorder %v2213_v34, 2.0  ;;  %vm963_vm14 = vcmp.eq.f32.partialorder %v2213_v34, 3.0 }
 0x144   :  { %v873_v37 = vsel %vm867_vm11, %v2068_v25, 0.0  ;;  %v824_v41 = vsel %vm818_vm12, %v2068_v25, 0.0  ;;  %v921_v42 = vsel %vm915_vm13, %v2068_v25, 0.0  ;;  %v969_v31 = vsel %vm963_vm14, %v2068_v25, 0.0 }
 0x145   :  { %v880_v45 = vsel %vm828_vm15, %v873_v37, 0.0  ;;  %v832_v46 = vsel %vm828_vm15, %v824_v41, 0.0  ;;  %v928_v11 = vsel %vm828_vm15, %v921_v42, 0.0  ;;  %v976_v4 = vsel %vm828_vm15, %v969_v31, 0.0 }
 0x146   :  { %v881_v63 = vadd.f32 %v880_v45, %v2145_v40  ;;  %v833_v48 = vadd.f32 %v832_v46, %v2157_v49  ;;  %v929_v9 = vadd.f32 %v928_v11, %v927_v57  ;;  %v977_v6 = vadd.f32 %v976_v4, %v975_v60 }
 0x147   :  { %vm1105_vm0 = vcmp.eq.f32.partialorder %v2034_v32, 6.0  ;;  %vm1011_vm1 = vcmp.eq.f32.partialorder %v2213_v34, 4.0  ;;  %v1039_v8 = vrot.slane %v1038_v38, 2  ;;  %vm1059_vm2 = vcmp.eq.f32.partialorder %v2213_v34, 5.0 }
 0x148   :  { %v1084_v54 = vadd.f32 %v1083_v39, %v1082_v20  ;;  %v882_v51 = vrot.slane %v881_v63, 4  ;;  %v834_v52 = vrot.slane %v833_v48, 4  ;;  %v930_v50 = vrot.slane %v929_v9, 4 }
 0x149   :  { %v978_v56 = vrot.slane %v977_v6, 4  ;;  %vm1106_vm3 = vcmp.eq.f32.partialorder %v2125_v26, 6.0  ;;  %v1017_v40 = vsel %vm1011_vm1, %v2068_v25, 0.0  ;;  %v1040_v1 = vadd.f32 %v1039_v8, %v1038_v38 }
 0x14a   :  { %v1065_v49 = vsel %vm1059_vm2, %v2068_v25, 0.0  ;;  %v1085_v57 = vrot.slane %v1084_v54, 4  ;;  %v883_v60 = vadd.f32 %v882_v51, %v881_v63  ;;  %v835_v58 = vadd.f32 %v834_v52, %v833_v48 }
 0x14b   :  { %v931_v53 = vadd.f32 %v930_v50, %v929_v9  ;;  %v979_v14 = vadd.f32 %v978_v56, %v977_v6  ;;  %v1024_v44 = vsel %vm828_vm15, %v1017_v40, 0.0  ;;  %v1041_v12 = vrot.slane %v1040_v1, 1 }
 0x14c   :  { %v1072_v18 = vsel %vm828_vm15, %v1065_v49, 0.0  ;;  %v1086_v62 = vadd.f32 %v1085_v57, %v1084_v54  ;;  %v884_v30 = vrot.slane %v883_v60, 2  ;;  %v836_v21 = vrot.slane %v835_v58, 2 }
 0x14d   :  { %v932_v22 = vrot.slane %v931_v53, 2  ;;  %v980_v23 = vrot.slane %v979_v14, 2  ;;  %v1025_v28 = vadd.f32 %v1024_v44, %v2198_v5  ;;  %v2243_v61 = vadd.f32 %v1041_v12, %v1040_v1 }
 0x14e   :  { %v1073_v19 = vadd.f32 %v1072_v18, %v1071_v35  ;;  %v1087_v43 = vrot.slane %v1086_v62, 2  ;;  %v885_v2 = vadd.f32 %v884_v30, %v883_v60  ;;  %v837_v27 = vadd.f32 %v836_v21, %v835_v58 }
 0x14f   :  { %v933_v10 = vadd.f32 %v932_v22, %v931_v53  ;;  %v981_v36 = vadd.f32 %v980_v23, %v979_v14  ;;  %v1026_v16 = vrot.slane %v1025_v28, 4  ;;  %vm1107_vm4 = vcmp.eq.f32.partialorder %v2213_v34, 6.0 }
 0x150   :  { %v1074_v38 = vrot.slane %v1073_v19, 4  ;;  %v1088_v20 = vadd.f32 %v1087_v43, %v1086_v62  ;;  %v886_v39 = vrot.slane %v885_v2, 1  ;;  %v838_v37 = vrot.slane %v837_v27, 1 }
 0x151   :  { %v934_v41 = vrot.slane %v933_v10, 1  ;;  %v982_v42 = vrot.slane %v981_v36, 1  ;;  %v1027_v31 = vadd.f32 %v1026_v16, %v1025_v28  ;;  %v1111_v35 = vsel %vm1105_vm0, %v1905_v0, 0.0 }
 0x152   :  { %v1075_v45 = vadd.f32 %v1074_v38, %v1073_v19  ;;  %v1089_v5 = vrot.slane %v1088_v20, 1  ;;  %v2249_v46 = vadd.f32 %v886_v39, %v885_v2  ;;  %v2251_v11 = vadd.f32 %v838_v37, %v837_v27 }
 0x153   :  { %v2253_v4 = vadd.f32 %v934_v41, %v933_v10  ;;  %v2255_v63 = vadd.f32 %v982_v42, %v981_v36  ;;  %v1028_v48 = vrot.slane %v1027_v31, 2  ;;  %v1112_v8 = vsel %vm1106_vm3, %v2013_v17, 0.0 }
 0x154   :  { %v1076_v9 = vrot.slane %v1075_v45, 2  ;;  %v2257_v6 = vadd.f32 %v1089_v5, %v1088_v20  ;;  %901 = vrot.lane.b32.xlu1 %v2249_v46, %s1642_s13  ;;  %853 = vrot.lane.b32.xlu0 %v2251_v11, %s1642_s13  ;;  %v1113_v54 = vsel %vm1107_vm4, %v2068_v25, 0.0  ;;  %v1117_v51 = vsel %vm828_vm15, %v1111_v35, 0.0 }
 0x155   :  { %v1118_v52 = vsel %vm828_vm15, %v1112_v8, 0.0  ;;  %vm1108_vm5 = vcmp.eq.f32.partialorder %v1944_v33, 6.0  ;;  %v1029_v50 = vadd.f32 %v1028_v48, %v1027_v31  ;;  %v1120_v1 = vsel %vm828_vm15, %v1113_v54, 0.0 }
 0x156   :  { %v1077_v56 = vadd.f32 %v1076_v9, %v1075_v45  ;;  %v1119_v40 = vadd.f32 %v1118_v52, %v1117_v51  ;;  %vm1109_vm6 = vcmp.eq.f32.partialorder %v1976_v59, 6.0  ;;  %vm1110_vm7 = vcmp.eq.f32.partialorder %v2089_v47, 6.0 }
 0x157   :  { %v1114_v49 = vsel %vm1108_vm5, %v1790_v7, 0.0  ;;  %vm1153_vm8 = vcmp.eq.f32.partialorder %v2034_v32, 7.0  ;;  %v1030_v57 = vrot.slane %v1029_v50, 1  ;;  %v1115_v53 = vsel %vm1109_vm6, %v1848_v24, 0.0 }
 0x158   :  { %v1078_v60 = vrot.slane %v1077_v56, 1  ;;  %v1121_v58 = vadd.f32 %v1120_v1, %v1119_v40  ;;  %949 = vrot.lane.b32.xlu1 %v2253_v4, %s1642_s13  ;;  %951 = vrot.lane.b32.xlu0 %v2207_v15, %s1642_s13  ;;  %v1116_v14 = vsel %vm1110_vm7, %v1949_v3, 0.0  ;;  %v1128_v44 = vsel %vm828_vm15, %v1114_v49, 0.0 }
 0x159   :  { %v1129_v12 = vsel %vm828_vm15, %v1115_v53, 0.0  ;;  %vm1154_vm9 = vcmp.eq.f32.partialorder %v2125_v26, 7.0  ;;  %v2286_v18 = vadd.f32 %v1030_v57, %v1029_v50  ;;  %v1131_v22 = vsel %vm828_vm15, %v1116_v14, 0.0 }
 0x15a   :  { %v2288_v62 = vadd.f32 %v1078_v60, %v1077_v56  ;;  %v1122_v30 = vrot.slane %v1121_v58, 4  ;;  %v1130_v21 = vadd.f32 %v1129_v12, %v1128_v44  ;;  %vm1155_vm10 = vcmp.eq.f32.partialorder %v2213_v34, 7.0 }
 0x15b   :  { %v1159_v23 = vsel %vm1153_vm8, %v1905_v0, 0.0  ;;  %v1160_v28 = vsel %vm1154_vm9, %v2013_v17, 0.0  ;;  %v1161_v2 = vsel %vm1155_vm10, %v2068_v25, 0.0  ;;  %vm1156_vm11 = vcmp.eq.f32.partialorder %v1944_v33, 7.0 }
 0x15c   :  { %v1123_v19 = vadd.f32 %v1122_v30, %v1121_v58  ;;  %v1132_v43 = vadd.f32 %v1131_v22, %v1130_v21  ;;  %v1165_v27 = vsel %vm828_vm15, %v1159_v23, 0.0  ;;  %997 = vrot.lane.b32.xlu1 %v2255_v63, %s1642_s13  ;;  %999 = vrot.lane.b32.xlu0 %v2217_v13, %s1642_s13  ;;  %v1166_v10 = vsel %vm828_vm15, %v1160_v28, 0.0 }
 0x15d   :  { %v1168_v36 = vsel %vm828_vm15, %v1161_v2, 0.0  ;;  %vm1157_vm12 = vcmp.eq.f32.partialorder %v1976_v59, 7.0  ;;  %v1167_v20 = vadd.f32 %v1166_v10, %v1165_v27  ;;  %vm1158_vm13 = vcmp.eq.f32.partialorder %v2089_v47, 7.0 }
 0x15e   :  { %v1124_v16 = vrot.slane %v1123_v19, 2  ;;  %v1133_v38 = vrot.slane %v1132_v43, 4  ;;  %v1162_v39 = vsel %vm1156_vm11, %v1790_v7, 0.0  ;;  %v1163_v37 = vsel %vm1157_vm12, %v1848_v24, 0.0 }
 0x15f   :  { %v1164_v41 = vsel %vm1158_vm13, %v1949_v3, 0.0  ;;  %vm1201_vm14 = vcmp.eq.f32.partialorder %v2034_v32, 8.0  ;;  %v1169_v45 = vadd.f32 %v1168_v36, %v1167_v20  ;;  %v1176_v5 = vsel %vm828_vm15, %v1162_v39, 0.0 }
 0x160   :  { %v1125_v42 = vadd.f32 %v1124_v16, %v1123_v19  ;;  %v1134_v31 = vadd.f32 %v1133_v38, %v1132_v43  ;;  %1045 = vrot.lane.b32.xlu1 %v2286_v18, %s1642_s13  ;;  %1047 = vrot.lane.b32.xlu0 %v2243_v61, %s1642_s13  ;;  %v1177_v35 = vsel %vm828_vm15, %v1163_v37, 0.0  ;;  %v1179_v48 = vsel %vm828_vm15, %v1164_v41, 0.0 }
 0x161   :  { %vm1202_vm0 = vcmp.eq.f32.partialorder %v2125_v26, 8.0  ;;  %vm1203_vm1 = vcmp.eq.f32.partialorder %v2213_v34, 8.0  ;;  %v1170_v54 = vrot.slane %v1169_v45, 4  ;;  %v1178_v51 = vadd.f32 %v1177_v35, %v1176_v5 }
 0x162   :  { %v1126_v9 = vrot.slane %v1125_v42, 1  ;;  %v1135_v8 = vrot.slane %v1134_v31, 2  ;;  %v1207_v52 = vsel %vm1201_vm14, %v1905_v0, 0.0  ;;  %v1208_v50 = vsel %vm1202_vm0, %v2013_v17, 0.0 }
 0x163   :  { %v1209_v56 = vsel %vm1203_vm1, %v2068_v25, 0.0  ;;  %vm1204_vm2 = vcmp.eq.f32.partialorder %v1944_v33, 8.0  ;;  %v1171_v49 = vadd.f32 %v1170_v54, %v1169_v45  ;;  %v1180_v57 = vadd.f32 %v1179_v48, %v1178_v51 }
 0x164   :  { %v2324_v40 = vadd.f32 %v1126_v9, %v1125_v42  ;;  %v1136_v1 = vadd.f32 %v1135_v8, %v1134_v31  ;;  %1093 = vrot.lane.b32.xlu1 %v2288_v62, %s1642_s13  ;;  %1095 = vrot.lane.b32.xlu0 %v2257_v6, %s1642_s13  ;;  %v1213_v60 = vsel %vm828_vm15, %v1207_v52, 0.0  ;;  %v1214_v58 = vsel %vm828_vm15, %v1208_v50, 0.0 }
 0x165   :  { %v1216_v53 = vsel %vm828_vm15, %v1209_v56, 0.0  ;;  %vm1205_vm3 = vcmp.eq.f32.partialorder %v1976_v59, 8.0  ;;  %v1172_v44 = vrot.slane %v1171_v49, 2  ;;  %v1181_v12 = vrot.slane %v1180_v57, 4 }
 0x166   :  { %v1137_v14 = vrot.slane %v1136_v1, 1  ;;  %v1215_v30 = vadd.f32 %v1214_v58, %v1213_v60  ;;  %vm1206_vm4 = vcmp.eq.f32.partialorder %v2089_v47, 8.0  ;;  %v1210_v21 = vsel %vm1204_vm2, %v1790_v7, 0.0 }
 0x167   :  { %v1211_v22 = vsel %vm1205_vm3, %v1848_v24, 0.0  ;;  %vm1249_vm5 = vcmp.eq.f32.partialorder %v2034_v32, 9.0  ;;  %v1173_v28 = vadd.f32 %v1172_v44, %v1171_v49  ;;  %v1182_v19 = vadd.f32 %v1181_v12, %v1180_v57 }
 0x168   :  { %v2340_v23 = vadd.f32 %v1137_v14, %v1136_v1  ;;  %v1217_v43 = vadd.f32 %v1216_v53, %v1215_v30  ;;  %1141 = vrot.lane.b32.xlu1 %v2324_v40, %s1642_s13  ;;  %v1212_v2 = vsel %vm1206_vm4, %v1949_v3, 0.0  ;;  %v1224_v27 = vsel %vm828_vm15, %v1210_v21, 0.0 }
 0x169   :  { %v1225_v10 = vsel %vm828_vm15, %v1211_v22, 0.0  ;;  %vm1250_vm6 = vcmp.eq.f32.partialorder %v2125_v26, 9.0  ;;  %v1174_v36 = vrot.slane %v1173_v28, 1  ;;  %v1183_v16 = vrot.slane %v1182_v19, 2 }
 0x16a   :  { %1143 = vrot.lane.b32.xlu0 %v2340_v23, %s1642_s13  ;;  %v1218_v38 = vrot.slane %v1217_v43, 4  ;;  %v1226_v20 = vadd.f32 %v1225_v10, %v1224_v27  ;;  %v1227_v39 = vsel %vm828_vm15, %v1212_v2, 0.0  ;;  %vm1251_vm7 = vcmp.eq.f32.partialorder %v2213_v34, 9.0 }
 0x16b   :  { %v1255_v37 = vsel %vm1249_vm5, %v1905_v0, 0.0  ;;  %v1256_v41 = vsel %vm1250_vm6, %v2013_v17, 0.0  ;;  %v2356_v42 = vadd.f32 %v1174_v36, %v1173_v28  ;;  %v1184_v31 = vadd.f32 %v1183_v16, %v1182_v19 }
 0x16c   :  { %v1219_v45 = vadd.f32 %v1218_v38, %v1217_v43  ;;  %v1228_v5 = vadd.f32 %v1227_v39, %v1226_v20  ;;  %v1257_v35 = vsel %vm1251_vm7, %v2068_v25, 0.0  ;;  %v1261_v48 = vsel %vm828_vm15, %v1255_v37, 0.0 }
 0x16d   :  { %v1262_v9 = vsel %vm828_vm15, %v1256_v41, 0.0  ;;  %vm1252_vm8 = vcmp.eq.f32.partialorder %v1944_v33, 9.0  ;;  %1189 = vrot.lane.b32.xlu1 %v2356_v42, %s1642_s13  ;;  %v1185_v8 = vrot.slane %v1184_v31, 1  ;;  %v1264_v50 = vsel %vm828_vm15, %v1257_v35, 0.0 }
 0x16e   :  { %v1220_v54 = vrot.slane %v1219_v45, 2  ;;  %v1229_v51 = vrot.slane %v1228_v5, 4  ;;  %v1263_v52 = vadd.f32 %v1262_v9, %v1261_v48  ;;  %vm1253_vm9 = vcmp.eq.f32.partialorder %v1976_v59, 9.0 }
 0x16f   :  { %vm1254_vm10 = vcmp.eq.f32.partialorder %v2089_v47, 9.0  ;;  %v1258_v56 = vsel %vm1252_vm8, %v1790_v7, 0.0  ;;  %v2368_v1 = vadd.f32 %v1185_v8, %v1184_v31  ;;  %v1259_v58 = vsel %vm1253_vm9, %v1848_v24, 0.0 }
 0x170   :  { %v1221_v49 = vadd.f32 %v1220_v54, %v1219_v45  ;;  %v1230_v57 = vadd.f32 %v1229_v51, %v1228_v5  ;;  %v1265_v60 = vadd.f32 %v1264_v50, %v1263_v52  ;;  %v1260_v53 = vsel %vm1254_vm10, %v1949_v3, 0.0 }
 0x171   :  { %v1272_v14 = vsel %vm828_vm15, %v1258_v56, 0.0  ;;  %vm1297_vm11 = vcmp.eq.f32.partialorder %v2034_v32, 10.0  ;;  %1191 = vrot.lane.b32.xlu0 %v2368_v1, %s1642_s13  ;;  %v1273_v21 = vsel %vm828_vm15, %v1259_v58, 0.0  ;;  %v1275_v28 = vsel %vm828_vm15, %v1260_v53, 0.0 }
 0x172   :  { %v1222_v44 = vrot.slane %v1221_v49, 1  ;;  %v1231_v12 = vrot.slane %v1230_v57, 2  ;;  %v1266_v30 = vrot.slane %v1265_v60, 4  ;;  %v1274_v22 = vadd.f32 %v1273_v21, %v1272_v14 }
 0x173   :  { %vm1298_vm12 = vcmp.eq.f32.partialorder %v2125_v26, 10.0  ;;  %vm1299_vm13 = vcmp.eq.f32.partialorder %v2213_v34, 10.0  ;;  %v1303_v27 = vsel %vm1297_vm11, %v1905_v0, 0.0  ;;  %vm1300_vm14 = vcmp.eq.f32.partialorder %v1944_v33, 10.0 }
 0x174   :  { %v2380_v19 = vadd.f32 %v1222_v44, %v1221_v49  ;;  %v1232_v43 = vadd.f32 %v1231_v12, %v1230_v57  ;;  %v1267_v2 = vadd.f32 %v1266_v30, %v1265_v60  ;;  %v1276_v10 = vadd.f32 %v1275_v28, %v1274_v22 }
 0x175   :  { %v1304_v36 = vsel %vm1298_vm12, %v2013_v17, 0.0  ;;  %v1305_v16 = vsel %vm1299_vm13, %v2068_v25, 0.0  ;;  %v1309_v38 = vsel %vm828_vm15, %v1303_v27, 0.0  ;;  %vm1301_vm0 = vcmp.eq.f32.partialorder %v1976_v59, 10.0 }
 0x176   :  { %1237 = vrot.lane.b32.xlu1 %v2380_v19, %s1642_s13  ;;  %v1233_v20 = vrot.slane %v1232_v43, 1  ;;  %v1268_v39 = vrot.slane %v1267_v2, 2  ;;  %v1310_v37 = vsel %vm828_vm15, %v1304_v36, 0.0  ;;  %v1312_v41 = vsel %vm828_vm15, %v1305_v16, 0.0 }
 0x177   :  { %v1277_v31 = vrot.slane %v1276_v10, 4  ;;  %v1311_v45 = vadd.f32 %v1310_v37, %v1309_v38  ;;  %vm1302_vm1 = vcmp.eq.f32.partialorder %v2089_v47, 10.0  ;;  %v1306_v48 = vsel %vm1300_vm14, %v1790_v7, 0.0 }
 0x178   :  { %v2392_v5 = vadd.f32 %v1233_v20, %v1232_v43  ;;  %v1269_v35 = vadd.f32 %v1268_v39, %v1267_v2  ;;  %v1307_v54 = vsel %vm1301_vm0, %v1848_v24, 0.0  ;;  %v1308_v51 = vsel %vm1302_vm1, %v1949_v3, 0.0 }
 0x179   :  { %v1278_v9 = vadd.f32 %v1277_v31, %v1276_v10  ;;  %v1313_v8 = vadd.f32 %v1312_v41, %v1311_v45  ;;  %v1320_v50 = vsel %vm828_vm15, %v1306_v48, 0.0  ;;  %v1321_v56 = vsel %vm828_vm15, %v1307_v54, 0.0 }
 0x17a   :  { %1239 = vrot.lane.b32.xlu0 %v2392_v5, %s1642_s13  ;;  %v1270_v52 = vrot.slane %v1269_v35, 1  ;;  %v1323_v49 = vsel %vm828_vm15, %v1308_v51, 0.0  ;;  %v1322_v58 = vadd.f32 %v1321_v56, %v1320_v50  ;;  %vm1345_vm2 = vcmp.eq.f32.partialorder %v2034_v32, 11.0 }
 0x17b   :  { %v1279_v57 = vrot.slane %v1278_v9, 2  ;;  %v1314_v60 = vrot.slane %v1313_v8, 4  ;;  %vm1346_vm3 = vcmp.eq.f32.partialorder %v2125_v26, 11.0  ;;  %vm1347_vm4 = vcmp.eq.f32.partialorder %v2213_v34, 11.0 }
 0x17c   :  { %v2404_v53 = vadd.f32 %v1270_v52, %v1269_v35  ;;  %v1351_v14 = vsel %vm1345_vm2, %v1905_v0, 0.0  ;;  %v1324_v30 = vadd.f32 %v1323_v49, %v1322_v58  ;;  %v1352_v21 = vsel %vm1346_vm3, %v2013_v17, 0.0 }
 0x17d   :  { %v1280_v44 = vadd.f32 %v1279_v57, %v1278_v9  ;;  %v1315_v12 = vadd.f32 %v1314_v60, %v1313_v8  ;;  %v1353_v22 = vsel %vm1347_vm4, %v2068_v25, 0.0  ;;  %v1357_v32 = vsel %vm828_vm15, %v1351_v14, 0.0 }
 0x17e   :  { %1285 = vrot.lane.b32.xlu1 %v2404_v53, %s1642_s13  ;;  %v1358_v28 = vsel %vm828_vm15, %v1352_v21, 0.0  ;;  %vm1348_vm5 = vcmp.eq.f32.partialorder %v1944_v33, 11.0  ;;  %v1325_v43 = vrot.slane %v1324_v30, 4  ;;  %v1360_v2 = vsel %vm828_vm15, %v1353_v22, 0.0 }
 0x17f   :  { %v1281_v26 = vrot.slane %v1280_v44, 1  ;;  %v1316_v34 = vrot.slane %v1315_v12, 2  ;;  %v1359_v0 = vadd.f32 %v1358_v28, %v1357_v32  ;;  %vm1349_vm6 = vcmp.eq.f32.partialorder %v1976_v59, 11.0 }
 0x180   :  { %vm1350_vm7 = vcmp.eq.f32.partialorder %v2089_v47, 11.0  ;;  %v1354_v17 = vsel %vm1348_vm5, %v1790_v7, 0.0  ;;  %v1326_v10 = vadd.f32 %v1325_v43, %v1324_v30  ;;  %v1355_v16 = vsel %vm1349_vm6, %v1848_v24, 0.0 }
 0x181   :  { %v2420_v27 = vadd.f32 %v1281_v26, %v1280_v44  ;;  %v1317_v25 = vadd.f32 %v1316_v34, %v1315_v12  ;;  %v1361_v36 = vadd.f32 %v1360_v2, %v1359_v0  ;;  %v1356_v33 = vsel %vm1350_vm7, %v1949_v3, 0.0 }
 0x182   :  { %v1368_v38 = vsel %vm828_vm15, %v1354_v17, 0.0  ;;  %v1327_v59 = vrot.slane %v1326_v10, 2  ;;  %v1369_v47 = vsel %vm828_vm15, %v1355_v16, 0.0  ;;  %v1371_v37 = vsel %vm828_vm15, %v1356_v33, 0.0 }
 0x183   :  { %1287 = vrot.lane.b32.xlu0 %v2420_v27, %s1642_s13  ;;  %v1318_v20 = vrot.slane %v1317_v25, 1  ;;  %v1362_v39 = vrot.slane %v1361_v36, 4  ;;  %v1370_v7 = vadd.f32 %v1369_v47, %v1368_v38  ;;  %vm1396_vm15 = vcmask 1041409  }
 0x184   :  { %v1328_v31 = vadd.f32 %v1327_v59, %v1326_v10  ;;  %vm1399_vm8 = vcmask 123920   ;;  %vm1421_vm9 = vcmask 107520  }
 0x185   :  { %v2429_v41 = vadd.f32 %v1318_v20, %v1317_v25  ;;  %v1363_v45 = vadd.f32 %v1362_v39, %v1361_v36  ;;  %v1372_v24 = vadd.f32 %v1371_v37, %v1370_v7 }
 0x186   :  { %v1329_v3 = vrot.slane %v1328_v31, 1 }
 0x187   :  { %1333 = vrot.lane.b32.xlu1 %v2429_v41, %s1642_s13  ;;  %v1364_v35 = vrot.slane %v1363_v45, 2  ;;  %v1373_v48 = vrot.slane %v1372_v24, 4 }
 0x188   :  { %v2433_v9 = vadd.f32 %v1329_v3, %v1328_v31 }
 0x189   :  { %v1365_v8 = vadd.f32 %v1364_v35, %v1363_v45  ;;  %v1374_v54 = vadd.f32 %v1373_v48, %v1372_v24 }
 0x18a   :  { %1335 = vrot.lane.b32.xlu0 %v2433_v9, %s1642_s13 }
 0x18b   :  { %v1366_v51 = vrot.slane %v1365_v8, 1  ;;  %v1375_v52 = vrot.slane %v1374_v54, 2 }
 0x18d   :  { %v2437_v50 = vadd.f32 %v1366_v51, %v1365_v8  ;;  %v1376_v56 = vadd.f32 %v1375_v52, %v1374_v54 }
 0x18f   :  { %1381 = vrot.lane.b32.xlu1 %v2437_v50, %s1642_s13  ;;  %v1377_v49 = vrot.slane %v1376_v56, 1 }
 0x191   :  { %v2441_v57 = vadd.f32 %v1377_v49, %v1376_v56 }
 0x193   :  { %1383 = vrot.lane.b32.xlu0 %v2441_v57, %s1642_s13 }
 0x194   :  { %v904_v60 = vpop.permute.xlu1 %903 }
 0x195   :  { %v908_v25 = vsub.f32 %v2119_v29, %v904_v60 }
 0x197   :  { %v910_v39 = vmax.f32 %v908_v25, 0.0 }
 0x199   :  { %v856_v58 = vpop.permute.xlu0 %855 }
 0x19a   :  { %v860_v10 = vsub.f32 %v2134_v55, %v856_v58 }
 0x19c   :  { %v862_v47 = vmax.f32 %v860_v10, 0.0 }
 0x19e   :  { %v912_v3 = vadd.f32 %v910_v39, %v862_v47 }
 0x1c6   :  { %v902_v14 = vpop.permute.xlu1 %901  ;;  %v854_v44 = vpop.permute.xlu0 %853 }
 0x1c7   :  { %v907_v36 = vsub.f32 %v2249_v46, %v902_v14  ;;  %v859_v16 = vsub.f32 %v2251_v11, %v854_v44 }
 0x1c9   :  { %v909_v37 = vmax.f32 %v907_v36, 0.0  ;;  %v861_v31 = vmax.f32 %v859_v16, 0.0 }
 0x1ca   :  { %v950_v12 = vpop.permute.xlu1 %949  ;;  %v952_v30 = vpop.permute.xlu0 %951 }
 0x1cb   :  { %v956_v38 = vsub.f32 %v2207_v15, %v952_v30  ;;  %v955_v20 = vsub.f32 %v2253_v4, %v950_v12  ;;  %v911_v35 = vadd.f32 %v909_v37, %v861_v31 }
 0x1cd   :  { %v958_v45 = vmax.f32 %v956_v38, 0.0  ;;  %v957_v46 = vmax.f32 %v955_v20, 0.0 }
 0x1ce   :  { %v998_v21 = vpop.permute.xlu1 %997  ;;  %v1000_v22 = vpop.permute.xlu0 %999 }
 0x1cf   :  { %v1004_v7 = vsub.f32 %v2217_v13, %v1000_v22  ;;  %v1003_v29 = vsub.f32 %v2255_v63, %v998_v21  ;;  %v960_v54 = vadd.f32 %v958_v45, %v912_v3  ;;  %v959_v52 = vadd.f32 %v957_v46, %v911_v35 }
 0x1d1   :  { %v1006_v15 = vmax.f32 %v1004_v7, 0.0  ;;  %v1005_v48 = vmax.f32 %v1003_v29, 0.0 }
 0x1d2   :  { %v1046_v32 = vpop.permute.xlu1 %1045  ;;  %v1048_v28 = vpop.permute.xlu0 %1047 }
 0x1d3   :  { %v1052_v55 = vsub.f32 %v2243_v61, %v1048_v28  ;;  %v1051_v11 = vsub.f32 %v2286_v18, %v1046_v32  ;;  %v1008_v49 = vadd.f32 %v1006_v15, %v960_v54  ;;  %v1007_v58 = vadd.f32 %v1005_v48, %v959_v52 }
 0x1d5   :  { %v1054_v51 = vmax.f32 %v1052_v55, 0.0  ;;  %v1053_v56 = vmax.f32 %v1051_v11, 0.0 }
 0x1d6   :  { %v1094_v26 = vpop.permute.xlu1 %1093  ;;  %v1096_v34 = vpop.permute.xlu0 %1095 }
 0x1d7   :  { %v1100_v4 = vsub.f32 %v2257_v6, %v1096_v34  ;;  %v1099_v8 = vsub.f32 %v2288_v62, %v1094_v26  ;;  %v1056_v12 = vadd.f32 %v1054_v51, %v1008_v49  ;;  %v1055_v21 = vadd.f32 %v1053_v56, %v1007_v58 }
 0x1d9   :  { %v1102_v18 = vmax.f32 %v1100_v4, 0.0  ;;  %v1101_v14 = vmax.f32 %v1099_v8, 0.0 }
 0x1da   :  { %v1142_v43 = vpop.permute.xlu1 %1141 }
 0x1db   :  { %v1147_v61 = vsub.f32 %v2324_v40, %v1142_v43  ;;  %v1104_v32 = vadd.f32 %v1102_v18, %v1056_v12  ;;  %v1103_v34 = vadd.f32 %v1101_v14, %v1055_v21 }
 0x1dc   :  { %v1144_v0 = vpop.permute.xlu0 %1143 }
 0x1dd   :  { %v1148_v63 = vsub.f32 %v2340_v23, %v1144_v0  ;;  %v1149_v22 = vmax.f32 %v1147_v61, 0.0 }
 0x1df   :  { %v1190_v2 = vpop.permute.xlu1 %1189  ;;  %v1150_v62 = vmax.f32 %v1148_v63, 0.0 }
 0x1e0   :  { %v1195_v6 = vsub.f32 %v2356_v42, %v1190_v2 }
 0x1e1   :  { %v1152_v43 = vadd.f32 %v1150_v62, %v1104_v32 }
 0x1e3   :  { %v1192_v17 = vpop.permute.xlu0 %1191 }
 0x1e4   :  { %v1196_v60 = vsub.f32 %v2368_v1, %v1192_v17  ;;  %v1197_v1 = vmax.f32 %v1195_v6, 0.0  ;;  %v1151_v17 = vadd.f32 %v1149_v22, %v1103_v34 }
 0x1e6   :  { %v1198_v28 = vmax.f32 %v1196_v60, 0.0  ;;  %v1199_v38 = vadd.f32 %v1197_v1, %v1151_v17 }
 0x1e8   :  { %v1238_v33 = vpop.permute.xlu1 %1237 }
 0x1e9   :  { %v1243_v40 = vsub.f32 %v2380_v19, %v1238_v33 }
 0x1eb   :  { %v1245_v10 = vmax.f32 %v1243_v40, 0.0 }
 0x1ec   :  { %v1240_v59 = vpop.permute.xlu0 %1239 }
 0x1ed   :  { %v1244_v30 = vsub.f32 %v2392_v5, %v1240_v59  ;;  %v1200_v5 = vadd.f32 %v1198_v28, %v1152_v43  ;;  %v1247_v39 = vadd.f32 %v1245_v10, %v1199_v38 }
 0x1ef   :  { %v1246_v0 = vmax.f32 %v1244_v30, 0.0 }
 0x1f0   :  { %v1286_v24 = vpop.permute.xlu1 %1285 }
 0x1f1   :  { %v1291_v42 = vsub.f32 %v2404_v53, %v1286_v24  ;;  %v1248_v20 = vadd.f32 %v1246_v0, %v1200_v5  ;;  %v1647_v0 = vmov 0  }
 0x1f3   :  { %v1293_v19 = vmax.f32 %v1291_v42, 0.0 }
 0x1f5   :  { %v1288_v13 = vpop.permute.xlu0 %1287 }
 0x1f6   :  { %v1292_v26 = vsub.f32 %v2420_v27, %v1288_v13 }
 0x1f8   :  { %v1294_v36 = vmax.f32 %v1292_v26, 0.0 }
 0x1f9   :  { %v1334_v44 = vpop.permute.xlu1 %1333 }
 0x1fa   :  { %v1339_v16 = vsub.f32 %v2429_v41, %v1334_v44  ;;  %v1296_v47 = vadd.f32 %v1294_v36, %v1248_v20 }
 0x1fc   :  { %v1336_v23 = vpop.permute.xlu0 %1335  ;;  %v1341_v7 = vmax.f32 %v1339_v16, 0.0 }
 0x1fd   :  { %v1340_v2 = vsub.f32 %v2433_v9, %v1336_v23  ;;  %v1295_v9 = vadd.f32 %v1293_v19, %v1247_v39 }
 0x1ff   :  { %v1342_v33 = vmax.f32 %v1340_v2, 0.0  ;;  %v1343_v45 = vadd.f32 %v1341_v7, %v1295_v9 }
 0x201   :  { %v1382_v25 = vpop.permute.xlu1 %1381  ;;  %v1344_v37 = vadd.f32 %v1342_v33, %v1296_v47 }
 0x202   :  { %v1387_v27 = vsub.f32 %v2437_v50, %v1382_v25 }
 0x204   :  { %v1389_v31 = vmax.f32 %v1387_v27, 0.0 }
 0x205   :  { %v1384_v59 = vpop.permute.xlu0 %1383 }
 0x206   :  { %v1388_v53 = vsub.f32 %v2441_v57, %v1384_v59  ;;  %v1391_v41 = vadd.f32 %v1389_v31, %v1343_v45 }
 0x208   :  { %v1390_v29 = vmax.f32 %v1388_v53, 0.0 }
 0x20a   :  { %v1392_v55 = vadd.f32 %v1390_v29, %v1344_v37 }
 0x20c   :  { %v1395_v46 = vrot.slane %v1392_v55, 7 }
 0x20e   :  { %v1397_v11 = vsel %vm1396_vm15, %v1395_v46, %v1391_v41 }
 0x20f   :  { %v1400_v24 = vsel %vm1399_vm8, %v1397_v11, -inf }
 0x210   :  { %1401 = vmax.xlane.f32.xlu0 %v1400_v24 }
 0x29d   :  { %v1402_v50 = vpop.xlane.xlu0 %1401 }
 0x29e   :  { %v1403_v3 = vmax.f32 %v1402_v50, 1e-30 }
 0x2a0   :  { %1592 = vrcp.f32 %v1403_v3 }
 0x2aa   :  { %v1593_v15 = vpop.eup %1592 }
 0x2ab   :  { %v1405_v4 = vmul.f32 %v1593_v15, %v1403_v3 }
 0x2ad   :  { %v1406_v57 = vsub.f32 2.0, %v1405_v4 }
 0x2af   :  { %v1407_v35 = vmul.f32 %v1593_v15, %v1406_v57 }
 0x2b1   :  { %v1409_v48 = vrot.slane %v1407_v35, 1  ;;  %v1412_v13 = vmul.f32 %v1407_v35, %v1391_v41 }
 0x2b3   :  { %v1413_v8 = vmul.f32 %v1409_v48, %v1392_v55 }
 0x2b5   :  { %1428 = vrot.lane.b32.xlu0 %v1413_v8, %s1644_s0  ;;  %v1416_v54 = vrot.slane %v1413_v8, 7 }
 0x2b7   :  { %v1417_v51 = vsel %vm1396_vm15, %v1416_v54, %v1412_v13 }
 0x2b8   :  { %1418 = vrot.lane.b32.xlu1 %v1417_v51, %s1645_s6 }
 0x2b9   :  { %1436 = vrot.lane.b32.xlu0 %v1413_v8, %s1645_s6 }
 0x2bc   :  { %1426 = vrot.lane.b32.xlu1 %v1412_v13, %s1644_s0 }
 0x2bd   :  { %1434 = vrot.lane.b32.xlu0 %v1412_v13, %s1645_s6 }
 0x2c1   :  { %1442 = vrot.lane.b32.xlu0 %v1412_v13, %s1646_s7 }
 0x327   :  { %v1429_v56 = vpop.permute.xlu0 %1428 }
 0x328   :  { %v1433_v21 = vadd.f32 %v1429_v56, %v1413_v8  ;;  %v1453_v32 = vmax.f32 %v1413_v8, %v1429_v56 }
 0x32a   :  { %v1419_v63 = vpop.permute.xlu1 %1418 }
 0x32b   :  { %v1422_v52 = vsel %vm1421_vm9, %v1419_v63, 0.0  ;;  %1473 = vst.msk [vmem:[#allocation4] sm:$0x3] %vm1421_vm9, %v1419_v63  ;;  %v1437_v61 = vpop.permute.xlu0 %1436 }
 0x32c   :  { %1423 = vadd.xlane.f32.xlu1 %v1422_v52  ;;  %v1441_v28 = vadd.f32 %v1437_v61, %v1433_v21  ;;  %v1455_v1 = vmax.f32 %v1453_v32, %v1437_v61 }
 0x32e   :  { %v1427_v49 = vpop.permute.xlu1 %1426 }
 0x32f   :  { %v1435_v18 = vpop.permute.xlu0 %1434  ;;  %v1432_v60 = vadd.f32 %v1427_v49, %v1412_v13  ;;  %v1452_v6 = vmax.f32 %v1412_v13, %v1427_v49 }
 0x331   :  { %v1440_v58 = vadd.f32 %v1435_v18, %v1432_v60  ;;  %v1454_v12 = vmax.f32 %v1452_v6, %v1435_v18 }
 0x333   :  { %v1443_v14 = vpop.permute.xlu0 %1442 }
 0x334   :  { %v1448_v44 = vadd.f32 %v1443_v14, %v1440_v58  ;;  %v1456_v22 = vmax.f32 %v1454_v12, %v1443_v14 }
 0x336   :  { %v1450_v62 = vmul.f32 0.25, %v1448_v44  ;;  %vm1467_vm10 = vcmp.eq.f32.partialorder %v1456_v22, %v1412_v13 }
 0x338   :  { %v1458_v40 = vsub.f32 %v1456_v22, %v1450_v62 }
 0x33d   :  { %1444 = vrot.lane.b32.xlu1 %v1413_v8, %s1646_s7 }
 0x3b9   :  { %v1424_v30 = vpop.xlane.xlu1 %1423 }
 0x3ba   :  { %v1425_v23 = vmul.f32 0.071428575, %v1424_v30 }
 0x3bc   :  { %v1460_v26 = vmul.f32 0.1, %v1425_v23 }
 0x3bd   :  { %v1445_v34 = vpop.permute.xlu1 %1444 }
 0x3be   :  { %vm1465_vm11 = vcmp.gt.f32.partialorder %v1458_v40, %v1460_v26  ;;  %v1449_v43 = vadd.f32 %v1445_v34, %v1441_v28  ;;  %v1457_v17 = vmax.f32 %v1455_v1, %v1445_v34  ;;  %v1462_v5 = vrot.slane %v1460_v26, 1 }
 0x3bf   :  { %vm1469_vm12 = vmand %vm1465_vm11, %vm1467_vm10 }
 0x3c0   :  { %v1471_v42 = vsel %vm1469_vm12, 1, %v1647_v0  ;;  %v1451_v2 = vmul.f32 0.25, %v1449_v43  ;;  %vm1468_vm14 = vcmp.eq.f32.partialorder %v1457_v17, %v1413_v8 }
 0x3c1   :  { %v1474_v25 = vsub.s32 1, %v1471_v42 }
 0x3c2   :  { %v1459_v10 = vsub.f32 %v1457_v17, %v1451_v2 }
 0x3c3   :  { %1476 = vrot.lane.b32.xlu0 %v1474_v25, %s1644_s0 }
 0x3c4   :  { %vm1466_vm13 = vcmp.gt.f32.partialorder %v1459_v10, %v1462_v5 }
 0x3c5   :  { %vm1470_vm0 = vmand %vm1466_vm13, %vm1468_vm14 }
 0x3c6   :  { %v1472_v36 = vsel %vm1470_vm0, 1, %v1647_v0 }
 0x3c7   :  { %v1475_v16 = vsub.s32 1, %v1472_v36  ;;  %v1488_v38 = vrot.slane %v1472_v36, 7 }
 0x3c9   :  { %1478 = vrot.lane.b32.xlu1 %v1475_v16, %s1644_s0  ;;  %v1489_v20 = vsel %vm1396_vm15, %v1488_v38, %v1471_v42 }
 0x3ca   :  { %1490 = vrot.lane.b32.xlu0 %v1489_v20, %s1645_s6 }
 0x3cb   :  { %1605 = shalt.err (!%p1602_p4)
}
 0x3cc   :  { %s1606_s13 = scalar_lea.hbm %s2508_s2, 32 }
 0x3cd   :  { %p1607_p5 = scmp.ne.s32.totalorder %s2508_s2, %s1606_s13  ;;  %p1610_p6 = scmp.lt.u32.totalorder %s1606_s13, %s2508_s2 }
 0x3cf   :  { %p1612_p7 = pnand %p1610_p6, %p1607_p5 }
 0x3d1   :  { %1615 = shalt.err (!%p1612_p7)
}
 0x3d2   :  { %1515 = dma.vmem_to_hbm [thread:$0]  %s1513_s9, 32, %s2508_s2, [#allocation5]   ;;  %vm1486_vm1 = vcmask 74752   ;;  %vm1492_vm2 = vcmask 83024   ;;  %vm1494_vm3 = vcmask 107608  }
 0x3d3   :  { %s1649_s20 = smov [#allocation2]  }
 0x3d4   :  { %s1502_s21 = sshll.u32 %s1649_s20, 4  ;;  %s1503_s21 = int_to_ptr.vmem [resolvable:$true] %s1502_s21 }
 0x3d5   :  { %s1616_s2 = scalar_lea.vmem %s1503_s21, 32  ;;  %p1621_p9 = scmp.lt.s32.totalorder %s1503_s21, %s1503_s21 }
 0x3d6   :  { %p1617_p8 = scmp.ne.s32.totalorder %s1503_s21, %s1616_s2  ;;  %p1622_p10 = scmp.lt.s32.totalorder %s1616_s2, %s1616_s2 }
 0x3d8   :  { %p1623_p11 = por %p1622_p10, %p1621_p9 }
 0x3da   :  { %p1624_p12 = pnand %p1623_p11, %p1617_p8 }
 0x435   :  { %v1477_v19 = vpop.permute.xlu0 %1476 }
 0x436   :  { %v1480_v59 = vmul.u32 %v1477_v19, %v1471_v42 }
 0x43b   :  { %v1479_v33 = vpop.permute.xlu1 %1478 }
 0x43c   :  { %v1481_v27 = vmul.u32 %v1479_v33, %v1472_v36  ;;  %v1491_v53 = vpop.permute.xlu0 %1490 }
 0x43e   :  { %v1482_v39 = vrot.slane %v1481_v27, 7 }
 0x440   :  { %v1483_v47 = vsel %vm1396_vm15, %v1482_v39, %v1480_v59 }
 0x441   :  { %1484 = vrot.lane.b32.xlu1 %v1483_v47, %s1645_s6 }
 0x4b3   :  { %v1485_v7 = vpop.permute.xlu1 %1484 }
 0x4b4   :  { %1487 = vst.msk [vmem:[#allocation2] sm:$0x3] %vm1486_vm1, %v1485_v7 }
 0x4b5   :  { %1493 = vst.msk [vmem:[#allocation2] sm:$0x3] %vm1492_vm2, %v1491_v53 }
 0x4b6   :  { %1495 = vst.msk [vmem:[#allocation2] sm:$0x3] %vm1494_vm3, %v1647_v0 }
 0x4b7   :  { %1627 = shalt.err (!%p1624_p12)
}
 0x4b8   :  { %s1628_s24 = scalar_lea.hbm %s2507_s1, 32 }
 0x4b9   :  { %p1629_p13 = scmp.ne.s32.totalorder %s2507_s1, %s1628_s24  ;;  %p1632_p0 = scmp.lt.u32.totalorder %s1628_s24, %s2507_s1 }
 0x4bb   :  { %p1634_p1 = pnand %p1632_p0, %p1629_p13 }
 0x4bd   :  { %1637 = shalt.err (!%p1634_p1)
}
 0x4be   :  { %1505 = dma.vmem_to_hbm [thread:$0]  %s1503_s21, 32, %s2507_s1, [#allocation3]  }
 0x4bf   :  { %1638 = dma.done.wait [#allocation3], 32  }
 0x4c0   :  { %1639 = vsyncadd [#allocation3], 4294967264 }
 0x4c1   :  { %1640 = dma.done.wait [#allocation5], 32  }
 0x4c2   :  { %1641 = vsyncadd [#allocation5], 4294967264 }
 0x4c3   :  { %1522 = vsyncpa [#allocation3], 1 }
 0x4c4   :  { %1523 = vsyncpa [#allocation5], 1 }

</bundles_post_ra>
